<compile_context>
chip_gen: v6e
topology: v6e:2x2x1
jax: 0.10.0
libtpu: 0.0.40
codegen_flags: <defaults>
</compile_context>

<pallas_src>
import numpy as np
import jax
import jax.numpy as jnp
from jax.experimental import pallas as pl
from jax.experimental.pallas import tpu as pltpu

DT = 0.1


def _round_up(n, m):
    return ((n + m - 1) // m) * m


# ----------------------------------------------------------------------------
# Pallas kernel: sequential GRU recurrence + batched post-loop dv MLP.
# ----------------------------------------------------------------------------
def gru_mlp_kernel(
    x_ref,       # (T*B, 2)   time-major flattened [v_t, I_t]
    h0_ref,      # (B, HP)    lane-padded initial hidden state (pad lanes zero)
    wh_ref,      # (HP, 2*HP) packed hidden->gate weights: [r|n_raw] block, [z] block
    w1h_ref,     # (HP, M1)   MLP first layer, h part (zero rows above H)
    sm_ref,      # (16, HP)   packed small params (see wrapper)
    vpred_ref,   # OUT (T*B, 1)
    hn_ref,      # OUT (B, HP)
    hs_ref,      # SCRATCH (T*B, HP) hidden states for all timesteps
):
    TB = x_ref.shape[0]
    B, HP = h0_ref.shape
    T = TB // B
    M1 = w1h_ref.shape[1]

    # ---- hoisted loads (off the recurrence chain) ----------------------------
    x = x_ref[...]                # (TB, 2)
    wh = wh_ref[...]              # (HP, 2*HP)
    w1h = w1h_ref[...]            # (HP, M1)
    sm = sm_ref[...]              # (16, HP)

    v_col = x[:, 0:1]             # (TB, 1)
    i_col = x[:, 1:2]             # (TB, 1)

    # input->gate contributions for all timesteps (VPU only, valid at lanes 0:H)
    gi_r = v_col * sm[0:1] + i_col * sm[3:4] + sm[6:7]     # (TB, HP) incl. b_ir+b_hr
    gi_z = v_col * sm[1:2] + i_col * sm[4:5] + sm[7:8]     # (TB, HP) incl. b_iz+b_hz
    gi_n = v_col * sm[2:3] + i_col * sm[5:6] + sm[8:9]     # (TB, HP) incl. b_in only
    b_hn = sm[9:10]                                        # (1, HP)  b_hn (n gate)

    b1 = sm[10:11, 0:M1]          # (1, M1)
    w1i = sm[11:12, 0:M1]         # (1, M1)  W1's I column, as a row
    w2r = sm[12:13, 0:M1]         # (1, M1)  W2 as a row
    b2 = sm[13:14, 0:1]           # (1, 1)

    # ---- sequential GRU recurrence: one N=2*HP matmul + one roll per step ----
    h = h0_ref[...]                                        # (B, HP)
    for t in range(T):                                     # fully unrolled (T static)
        lo, hi = t * B, (t + 1) * B
        gh = jnp.dot(h, wh, preferred_element_type=jnp.float32)   # (B, 2*HP)
        g0 = gh[:, 0:HP]          # r_raw at lanes 0:H, n_raw at lanes HP//2:HP//2+H
        g1 = gh[:, HP:2 * HP]     # z_raw at lanes 0:H
        gn = pltpu.roll(g0, HP // 2, axis=1)   # n_raw -> lanes 0:H (self-inverse shift)
        r = jax.nn.sigmoid(gi_r[lo:hi] + g0)
        z = jax.nn.sigmoid(gi_z[lo:hi] + g1)
        n = jnp.tanh(gi_n[lo:hi] + r * (gn + b_hn))
        h = (1.0 - z) * n + z * h            # valid at lanes 0:H; pad lanes stay bounded
        hs_ref[lo:hi, :] = h                 # off-chain store for the post-loop MLP

    hn_ref[...] = h                          # wrapper slices lanes 0:H

    # ---- batched dv-MLP over the whole sequence (post-loop) ------------------
    # Junk in h pad lanes is harmless: w1h rows >= H are zero.
    h_all = hs_ref[...]                                    # (TB, HP)
    z1 = (jnp.dot(h_all, w1h, preferred_element_type=jnp.float32)
          + i_col * w1i + b1)                              # (TB, M1)
    a1 = jnp.maximum(z1, 0.0)
    dv = jnp.sum(a1 * w2r, axis=-1, keepdims=True) + b2    # (TB, 1)
    vpred_ref[...] = v_col + DT * dv


# ----------------------------------------------------------------------------
# Wrapper: layout plumbing + parameter packing (plain JAX glue).
# ----------------------------------------------------------------------------
def rnn_model_forward(v_seq, I_seq, params, h0=None):
    """v_seq, I_seq: (B, T, 1) float32.  Returns (v_pred (B,T,1), hn (1,B,H))."""
    B, T, _ = v_seq.shape
    H = params["W_hh"].shape[1]
    HP = _round_up(H, 128)           # lane-padded hidden width
    M1 = params["W1"].shape[0]       # MLP hidden width (128)
    assert 2 * H <= HP, "packed r|n gate layout needs 2*H <= 128"
    # TODO(synk): for H > 64 fall back to one 128-lane block per gate (N=3*HP).
    assert M1 <= HP

    f32 = jnp.float32
    W_ih = params["W_ih"].astype(f32)   # (3H, 2)
    W_hh = params["W_hh"].astype(f32)   # (3H, H)
    b_ih = params["b_ih"].astype(f32)   # (3H,)
    b_hh = params["b_hh"].astype(f32)   # (3H,)
    W1 = params["W1"].astype(f32)       # (M1, H+1)
    b1 = params["b1"].astype(f32)       # (M1,)
    W2 = params["W2"].astype(f32)       # (1, M1)
    b2 = params["b2"].astype(f32)       # (1,)

    if h0 is None:
        h0 = jnp.zeros((1, B, H), f32)

    # time-major flattened inputs: row index = t * B + b
    x = jnp.concatenate([v_seq, I_seq], axis=2).astype(f32)       # (B, T, 2)
    x_flat = jnp.transpose(x, (1, 0, 2)).reshape(T * B, 2)

    # Pad lanes of h0 are always re-zeroed here; the kernel relies on wh/w1h
    # having zero rows above H so pad-lane junk can never contaminate results.
    h0_pad = jnp.zeros((B, HP), f32).at[:, :H].set(h0[0].astype(f32))

    # packed hidden->gate weights:
    #   column block 0 (lanes 0:HP):  r at 0:H, n_raw at HP//2:HP//2+H
    #   column block 1 (lanes HP:):   z at 0:H
    NOFF = HP // 2
    wh = jnp.zeros((HP, 2 * HP), f32)
    wh = wh.at[:H, 0:H].set(W_hh[0:H].T)                    # r gate
    wh = wh.at[:H, NOFF:NOFF + H].set(W_hh[2 * H:].T)       # n gate (roll-64 aligned)
    wh = wh.at[:H, HP:HP + H].set(W_hh[H:2 * H].T)          # z gate

    # MLP first layer, h part, zero rows above H.
    w1h = jnp.zeros((HP, M1), f32).at[:H, :].set(W1[:, :H].T)

    def pad_h(v):  # (n,) -> (HP,)
        return jnp.pad(v, (0, HP - v.shape[0]))

    # packed small-parameter slab (16, HP): one prologue DMA.
    smalls = jnp.stack([
        pad_h(W_ih[0:H, 0]),                  # 0: v-weight, r
        pad_h(W_ih[H:2 * H, 0]),              # 1: v-weight, z
        pad_h(W_ih[2 * H:, 0]),               # 2: v-weight, n
        pad_h(W_ih[0:H, 1]),                  # 3: I-weight, r
        pad_h(W_ih[H:2 * H, 1]),              # 4: I-weight, z
        pad_h(W_ih[2 * H:, 1]),               # 5: I-weight, n
        pad_h(b_ih[0:H] + b_hh[0:H]),         # 6: bias r
        pad_h(b_ih[H:2 * H] + b_hh[H:2 * H]), # 7: bias z
        pad_h(b_ih[2 * H:]),                  # 8: bias n (input part)
        pad_h(b_hh[2 * H:]),                  # 9: b_hn (inside r*(.))
        pad_h(b1),                            # 10
        pad_h(W1[:, H]),                      # 11: W1's I column
        pad_h(W2[0]),                         # 12
        pad_h(b2),                            # 13
        jnp.zeros((HP,), f32),                # 14 (pad to 16 rows)
        jnp.zeros((HP,), f32),                # 15
    ])                                        # (16, HP)

    vmem = pl.BlockSpec(memory_space=pltpu.MemorySpace.VMEM)
    v_pred_flat, hn_pad = pl.pallas_call(
        gru_mlp_kernel,
        out_shape=(
            jax.ShapeDtypeStruct((T * B, 1), f32),
            jax.ShapeDtypeStruct((B, HP), f32),
        ),
        in_specs=[vmem] * 5,
        out_specs=(vmem, vmem),
        scratch_shapes=[
            pltpu.VMEM((T * B, HP), f32),     # h_seq slab for the batched MLP
        ],
        compiler_params=pltpu.CompilerParams(vmem_limit_bytes=32 * 1024 * 1024),
    )(x_flat, h0_pad, wh, w1h, smalls)

    v_pred = jnp.transpose(v_pred_flat.reshape(T, B, 1), (1, 0, 2))   # (B, T, 1)
    hn = hn_pad[:, :H][None]                                          # (1, B, H)
    return v_pred, hn

# TODO(synk): for long sequences / large batch, block over T with a resident-h
# accumulator ("arbitrary" axis), compute gi per T-block to keep VMEM O(block),
# and add a "parallel" batch grid axis so v7x's second TensorCore is used.


# ----------------------------------------------------------------------------
# Pure-JAX reference (mirrors the PyTorch module) for the correctness check.
# ----------------------------------------------------------------------------
def reference_forward(v_seq, I_seq, p, h0=None):
    B, T, _ = v_seq.shape
    H = p["W_hh"].shape[1]
    x = jnp.concatenate([v_seq, I_seq], axis=2)
    h = jnp.zeros((B, H), jnp.float32) if h0 is None else h0[0]
    W_ih, W_hh, b_ih, b_hh = p["W_ih"], p["W_hh"], p["b_ih"], p["b_hh"]

    def step(h, x_t):
        gi = x_t @ W_ih.T + b_ih
        gh = h @ W_hh.T + b_hh
        r = jax.nn.sigmoid(gi[:, :H] + gh[:, :H])
        z = jax.nn.sigmoid(gi[:, H:2 * H] + gh[:, H:2 * H])
        n = jnp.tanh(gi[:, 2 * H:] + r * gh[:, 2 * H:])
        h_new = (1.0 - z) * n + z * h
        return h_new, h_new

    hT, h_seq = jax.lax.scan(step, h, jnp.transpose(x, (1, 0, 2)))
    h_seq = jnp.transpose(h_seq, (1, 0, 2))               # (B, T, H)
    dv_in = jnp.concatenate([h_seq, I_seq], axis=2)
    dv = jnp.maximum(dv_in @ p["W1"].T + p["b1"], 0.0) @ p["W2"].T + p["b2"]
    return v_seq + DT * dv, hT[None]


def init_params(key, hidden_dim=32):
    H = hidden_dim
    ks = jax.random.split(key, 8)
    kg = 1.0 / np.sqrt(H)
    k1 = 1.0 / np.sqrt(H + 1)
    k2 = 1.0 / np.sqrt(128)
    u = lambda k, shape, lim: jax.random.uniform(k, shape, jnp.float32, -lim, lim)
    return {
        "W_ih": u(ks[0], (3 * H, 2), kg),
        "W_hh": u(ks[1], (3 * H, H), kg),
        "b_ih": u(ks[2], (3 * H,), kg),
        "b_hh": u(ks[3], (3 * H,), kg),
        "W1":   u(ks[4], (128, H + 1), k1),
        "b1":   u(ks[5], (128,), k1),
        "W2":   u(ks[6], (1, 128), k2),
        "b2":   u(ks[7], (1,), k2),
    }


if __name__ == "__main__":
    B, T, H = 2, 8, 32
    key = jax.random.PRNGKey(0)
    kp, kv, ki = jax.random.split(key, 3)

    params = init_params(kp, hidden_dim=H)
    v_seq = jax.random.normal(kv, (B, T, 1), jnp.float32)
    I_seq = jax.random.normal(ki, (B, T, 1), jnp.float32)

    v_pred, hn = rnn_model_forward(v_seq, I_seq, params)
    jax.block_until_ready((v_pred, hn))

    v_ref, hn_ref = reference_forward(v_seq, I_seq, params)
    assert v_pred.shape == (B, T, 1) and hn.shape == (1, B, H)
    np.testing.assert_allclose(np.asarray(v_pred), np.asarray(v_ref), rtol=1e-4, atol=1e-5)
    np.testing.assert_allclose(np.asarray(hn), np.asarray(hn_ref), rtol=1e-4, atol=1e-5)

    print("KERNEL_OK")
</pallas_src>

<mosaic_0001>
module attributes {stable_mosaic.version = 11 : i64} {
  func.func @gru_mlp_kernel(%arg0: memref<16x2xf32, #tpu.memory_space<vmem>>, %arg1: memref<2x128xf32, #tpu.memory_space<vmem>>, %arg2: memref<128x256xf32, #tpu.memory_space<vmem>>, %arg3: memref<128x128xf32, #tpu.memory_space<vmem>>, %arg4: memref<16x128xf32, #tpu.memory_space<vmem>>, %arg5: memref<16x1xf32, #tpu.memory_space<vmem>>, %arg6: memref<2x128xf32, #tpu.memory_space<vmem>>, %arg7: memref<16x128xf32, #tpu.memory_space<vmem>>) attributes {dimension_semantics = [], scalar_prefetch = 0 : i64, scratch_operands = 1 : i64, tpu.core_type = #tpu.core_type<tc>} {
    %c0 = arith.constant 0 : index
    %c0_0 = arith.constant 0 : index
    %0 = vector.load %arg0[%c0, %c0_0] : memref<16x2xf32, #tpu.memory_space<vmem>>, vector<16x2xf32>
    %c0_1 = arith.constant 0 : index
    %c0_2 = arith.constant 0 : index
    %1 = vector.load %arg2[%c0_1, %c0_2] : memref<128x256xf32, #tpu.memory_space<vmem>>, vector<128x256xf32>
    %c0_3 = arith.constant 0 : index
    %c0_4 = arith.constant 0 : index
    %2 = vector.load %arg3[%c0_3, %c0_4] : memref<128x128xf32, #tpu.memory_space<vmem>>, vector<128x128xf32>
    %c0_5 = arith.constant 0 : index
    %c0_6 = arith.constant 0 : index
    %3 = vector.load %arg4[%c0_5, %c0_6] : memref<16x128xf32, #tpu.memory_space<vmem>>, vector<16x128xf32>
    %4 = vector.extract_strided_slice %0 {offsets = [0, 0], sizes = [16, 1], strides = [1, 1]} : vector<16x2xf32> to vector<16x1xf32>
    %5 = vector.extract_strided_slice %0 {offsets = [0, 1], sizes = [16, 1], strides = [1, 1]} : vector<16x2xf32> to vector<16x1xf32>
    %6 = vector.extract_strided_slice %3 {offsets = [0, 0], sizes = [1, 128], strides = [1, 1]} : vector<16x128xf32> to vector<1x128xf32>
    %7 = vector.broadcast %4 : vector<16x1xf32> to vector<16x128xf32>
    %8 = vector.broadcast %6 : vector<1x128xf32> to vector<16x128xf32>
    %9 = arith.mulf %7, %8 : vector<16x128xf32>
    %10 = vector.extract_strided_slice %3 {offsets = [3, 0], sizes = [1, 128], strides = [1, 1]} : vector<16x128xf32> to vector<1x128xf32>
    %11 = vector.broadcast %5 : vector<16x1xf32> to vector<16x128xf32>
    %12 = vector.broadcast %10 : vector<1x128xf32> to vector<16x128xf32>
    %13 = arith.mulf %11, %12 : vector<16x128xf32>
    %14 = arith.addf %9, %13 : vector<16x128xf32>
    %15 = vector.extract_strided_slice %3 {offsets = [6, 0], sizes = [1, 128], strides = [1, 1]} : vector<16x128xf32> to vector<1x128xf32>
    %16 = vector.broadcast %15 : vector<1x128xf32> to vector<16x128xf32>
    %17 = arith.addf %14, %16 : vector<16x128xf32>
    %18 = vector.extract_strided_slice %3 {offsets = [1, 0], sizes = [1, 128], strides = [1, 1]} : vector<16x128xf32> to vector<1x128xf32>
    %19 = vector.broadcast %4 : vector<16x1xf32> to vector<16x128xf32>
    %20 = vector.broadcast %18 : vector<1x128xf32> to vector<16x128xf32>
    %21 = arith.mulf %19, %20 : vector<16x128xf32>
    %22 = vector.extract_strided_slice %3 {offsets = [4, 0], sizes = [1, 128], strides = [1, 1]} : vector<16x128xf32> to vector<1x128xf32>
    %23 = vector.broadcast %5 : vector<16x1xf32> to vector<16x128xf32>
    %24 = vector.broadcast %22 : vector<1x128xf32> to vector<16x128xf32>
    %25 = arith.mulf %23, %24 : vector<16x128xf32>
    %26 = arith.addf %21, %25 : vector<16x128xf32>
    %27 = vector.extract_strided_slice %3 {offsets = [7, 0], sizes = [1, 128], strides = [1, 1]} : vector<16x128xf32> to vector<1x128xf32>
    %28 = vector.broadcast %27 : vector<1x128xf32> to vector<16x128xf32>
    %29 = arith.addf %26, %28 : vector<16x128xf32>
    %30 = vector.extract_strided_slice %3 {offsets = [2, 0], sizes = [1, 128], strides = [1, 1]} : vector<16x128xf32> to vector<1x128xf32>
    %31 = vector.broadcast %4 : vector<16x1xf32> to vector<16x128xf32>
    %32 = vector.broadcast %30 : vector<1x128xf32> to vector<16x128xf32>
    %33 = arith.mulf %31, %32 : vector<16x128xf32>
    %34 = vector.extract_strided_slice %3 {offsets = [5, 0], sizes = [1, 128], strides = [1, 1]} : vector<16x128xf32> to vector<1x128xf32>
    %35 = vector.broadcast %5 : vector<16x1xf32> to vector<16x128xf32>
    %36 = vector.broadcast %34 : vector<1x128xf32> to vector<16x128xf32>
    %37 = arith.mulf %35, %36 : vector<16x128xf32>
    %38 = arith.addf %33, %37 : vector<16x128xf32>
    %39 = vector.extract_strided_slice %3 {offsets = [8, 0], sizes = [1, 128], strides = [1, 1]} : vector<16x128xf32> to vector<1x128xf32>
    %40 = vector.broadcast %39 : vector<1x128xf32> to vector<16x128xf32>
    %41 = arith.addf %38, %40 : vector<16x128xf32>
    %42 = vector.extract_strided_slice %3 {offsets = [9, 0], sizes = [1, 128], strides = [1, 1]} : vector<16x128xf32> to vector<1x128xf32>
    %43 = vector.extract_strided_slice %3 {offsets = [10, 0], sizes = [1, 128], strides = [1, 1]} : vector<16x128xf32> to vector<1x128xf32>
    %44 = vector.extract_strided_slice %3 {offsets = [11, 0], sizes = [1, 128], strides = [1, 1]} : vector<16x128xf32> to vector<1x128xf32>
    %45 = vector.extract_strided_slice %3 {offsets = [12, 0], sizes = [1, 128], strides = [1, 1]} : vector<16x128xf32> to vector<1x128xf32>
    %46 = vector.extract_strided_slice %3 {offsets = [13, 0], sizes = [1, 1], strides = [1, 1]} : vector<16x128xf32> to vector<1x1xf32>
    %c0_7 = arith.constant 0 : index
    %c0_8 = arith.constant 0 : index
    %47 = vector.load %arg1[%c0_7, %c0_8] : memref<2x128xf32, #tpu.memory_space<vmem>>, vector<2x128xf32>
    %cst = arith.constant dense<0.000000e+00> : vector<2x256xf32>
    %48 = tpu.matmul %47, %1, %cst {dimension_numbers = #tpu.dot_dimension_numbers<[1], [0], [0], [1], [0, 0, 1, 1], [], []>} : vector<2x128xf32>, vector<128x256xf32>, vector<2x256xf32> -> vector<2x256xf32>
    %49 = vector.extract_strided_slice %48 {offsets = [0, 0], sizes = [2, 128], strides = [1, 1]} : vector<2x256xf32> to vector<2x128xf32>
    %50 = vector.extract_strided_slice %48 {offsets = [0, 128], sizes = [2, 128], strides = [1, 1]} : vector<2x256xf32> to vector<2x128xf32>
    %c64_i32 = arith.constant 64 : i32
    %51 = tpu.dynamic_rotate %49 by %c64_i32 dim 1 : vector<2x128xf32>, i32 -> vector<2x128xf32>
    %52 = vector.extract_strided_slice %17 {offsets = [0, 0], sizes = [2, 128], strides = [1, 1]} : vector<16x128xf32> to vector<2x128xf32>
    %53 = arith.addf %52, %49 : vector<2x128xf32>
    %54 = arith.negf %53 : vector<2x128xf32>
    %55 = math.exp %54 : vector<2x128xf32>
    %cst_9 = arith.constant 1.000000e+00 : f32
    %56 = vector.broadcast %cst_9 : f32 to vector<2x128xf32>
    %57 = arith.addf %56, %55 : vector<2x128xf32>
    %58 = arith.divf %56, %57 : vector<2x128xf32>
    %59 = vector.extract_strided_slice %29 {offsets = [0, 0], sizes = [2, 128], strides = [1, 1]} : vector<16x128xf32> to vector<2x128xf32>
    %60 = arith.addf %59, %50 : vector<2x128xf32>
    %61 = arith.negf %60 : vector<2x128xf32>
    %62 = math.exp %61 : vector<2x128xf32>
    %cst_10 = arith.constant 1.000000e+00 : f32
    %63 = vector.broadcast %cst_10 : f32 to vector<2x128xf32>
    %64 = arith.addf %63, %62 : vector<2x128xf32>
    %65 = arith.divf %63, %64 : vector<2x128xf32>
    %66 = vector.extract_strided_slice %41 {offsets = [0, 0], sizes = [2, 128], strides = [1, 1]} : vector<16x128xf32> to vector<2x128xf32>
    %67 = vector.broadcast %42 : vector<1x128xf32> to vector<2x128xf32>
    %68 = arith.addf %51, %67 : vector<2x128xf32>
    %69 = arith.mulf %58, %68 : vector<2x128xf32>
    %70 = arith.addf %66, %69 : vector<2x128xf32>
    %71 = math.tanh %70 : vector<2x128xf32>
    %cst_11 = arith.constant 1.000000e+00 : f32
    %72 = vector.broadcast %cst_11 : f32 to vector<2x128xf32>
    %73 = arith.subf %72, %65 : vector<2x128xf32>
    %74 = arith.mulf %73, %71 : vector<2x128xf32>
    %75 = arith.mulf %65, %47 : vector<2x128xf32>
    %76 = arith.addf %74, %75 : vector<2x128xf32>
    %c0_12 = arith.constant 0 : index
    %c0_13 = arith.constant 0 : index
    %77 = vector.load %arg7[%c0_12, %c0_13] : memref<16x128xf32, #tpu.memory_space<vmem>>, vector<2x128xf32>
    tpu.vector_store %arg7[%c0_12, %c0_13], %76 {strides = array<i32>} : memref<16x128xf32, #tpu.memory_space<vmem>>, vector<2x128xf32>,
    %cst_14 = arith.constant dense<0.000000e+00> : vector<2x256xf32>
    %78 = tpu.matmul %76, %1, %cst_14 {dimension_numbers = #tpu.dot_dimension_numbers<[1], [0], [0], [1], [0, 0, 1, 1], [], []>} : vector<2x128xf32>, vector<128x256xf32>, vector<2x256xf32> -> vector<2x256xf32>
    %79 = vector.extract_strided_slice %78 {offsets = [0, 0], sizes = [2, 128], strides = [1, 1]} : vector<2x256xf32> to vector<2x128xf32>
    %80 = vector.extract_strided_slice %78 {offsets = [0, 128], sizes = [2, 128], strides = [1, 1]} : vector<2x256xf32> to vector<2x128xf32>
    %c64_i32_15 = arith.constant 64 : i32
    %81 = tpu.dynamic_rotate %79 by %c64_i32_15 dim 1 : vector<2x128xf32>, i32 -> vector<2x128xf32>
    %82 = vector.extract_strided_slice %17 {offsets = [2, 0], sizes = [2, 128], strides = [1, 1]} : vector<16x128xf32> to vector<2x128xf32>
    %83 = arith.addf %82, %79 : vector<2x128xf32>
    %84 = arith.negf %83 : vector<2x128xf32>
    %85 = math.exp %84 : vector<2x128xf32>
    %cst_16 = arith.constant 1.000000e+00 : f32
    %86 = vector.broadcast %cst_16 : f32 to vector<2x128xf32>
    %87 = arith.addf %86, %85 : vector<2x128xf32>
    %88 = arith.divf %86, %87 : vector<2x128xf32>
    %89 = vector.extract_strided_slice %29 {offsets = [2, 0], sizes = [2, 128], strides = [1, 1]} : vector<16x128xf32> to vector<2x128xf32>
    %90 = arith.addf %89, %80 : vector<2x128xf32>
    %91 = arith.negf %90 : vector<2x128xf32>
    %92 = math.exp %91 : vector<2x128xf32>
    %cst_17 = arith.constant 1.000000e+00 : f32
    %93 = vector.broadcast %cst_17 : f32 to vector<2x128xf32>
    %94 = arith.addf %93, %92 : vector<2x128xf32>
    %95 = arith.divf %93, %94 : vector<2x128xf32>
    %96 = vector.extract_strided_slice %41 {offsets = [2, 0], sizes = [2, 128], strides = [1, 1]} : vector<16x128xf32> to vector<2x128xf32>
    %97 = vector.broadcast %42 : vector<1x128xf32> to vector<2x128xf32>
    %98 = arith.addf %81, %97 : vector<2x128xf32>
    %99 = arith.mulf %88, %98 : vector<2x128xf32>
    %100 = arith.addf %96, %99 : vector<2x128xf32>
    %101 = math.tanh %100 : vector<2x128xf32>
    %cst_18 = arith.constant 1.000000e+00 : f32
    %102 = vector.broadcast %cst_18 : f32 to vector<2x128xf32>
    %103 = arith.subf %102, %95 : vector<2x128xf32>
    %104 = arith.mulf %103, %101 : vector<2x128xf32>
    %105 = arith.mulf %95, %76 : vector<2x128xf32>
    %106 = arith.addf %104, %105 : vector<2x128xf32>
    %c2 = arith.constant 2 : index
    %c0_19 = arith.constant 0 : index
    %107 = vector.load %arg7[%c2, %c0_19] : memref<16x128xf32, #tpu.memory_space<vmem>>, vector<2x128xf32>
    tpu.vector_store %arg7[%c2, %c0_19], %106 {strides = array<i32>} : memref<16x128xf32, #tpu.memory_space<vmem>>, vector<2x128xf32>,
    %cst_20 = arith.constant dense<0.000000e+00> : vector<2x256xf32>
    %108 = tpu.matmul %106, %1, %cst_20 {dimension_numbers = #tpu.dot_dimension_numbers<[1], [0], [0], [1], [0, 0, 1, 1], [], []>} : vector<2x128xf32>, vector<128x256xf32>, vector<2x256xf32> -> vector<2x256xf32>
    %109 = vector.extract_strided_slice %108 {offsets = [0, 0], sizes = [2, 128], strides = [1, 1]} : vector<2x256xf32> to vector<2x128xf32>
    %110 = vector.extract_strided_slice %108 {offsets = [0, 128], sizes = [2, 128], strides = [1, 1]} : vector<2x256xf32> to vector<2x128xf32>
    %c64_i32_21 = arith.constant 64 : i32
    %111 = tpu.dynamic_rotate %109 by %c64_i32_21 dim 1 : vector<2x128xf32>, i32 -> vector<2x128xf32>
    %112 = vector.extract_strided_slice %17 {offsets = [4, 0], sizes = [2, 128], strides = [1, 1]} : vector<16x128xf32> to vector<2x128xf32>
    %113 = arith.addf %112, %109 : vector<2x128xf32>
    %114 = arith.negf %113 : vector<2x128xf32>
    %115 = math.exp %114 : vector<2x128xf32>
    %cst_22 = arith.constant 1.000000e+00 : f32
    %116 = vector.broadcast %cst_22 : f32 to vector<2x128xf32>
    %117 = arith.addf %116, %115 : vector<2x128xf32>
    %118 = arith.divf %116, %117 : vector<2x128xf32>
    %119 = vector.extract_strided_slice %29 {offsets = [4, 0], sizes = [2, 128], strides = [1, 1]} : vector<16x128xf32> to vector<2x128xf32>
    %120 = arith.addf %119, %110 : vector<2x128xf32>
    %121 = arith.negf %120 : vector<2x128xf32>
    %122 = math.exp %121 : vector<2x128xf32>
    %cst_23 = arith.constant 1.000000e+00 : f32
    %123 = vector.broadcast %cst_23 : f32 to vector<2x128xf32>
    %124 = arith.addf %123, %122 : vector<2x128xf32>
    %125 = arith.divf %123, %124 : vector<2x128xf32>
    %126 = vector.extract_strided_slice %41 {offsets = [4, 0], sizes = [2, 128], strides = [1, 1]} : vector<16x128xf32> to vector<2x128xf32>
    %127 = vector.broadcast %42 : vector<1x128xf32> to vector<2x128xf32>
    %128 = arith.addf %111, %127 : vector<2x128xf32>
    %129 = arith.mulf %118, %128 : vector<2x128xf32>
    %130 = arith.addf %126, %129 : vector<2x128xf32>
    %131 = math.tanh %130 : vector<2x128xf32>
    %cst_24 = arith.constant 1.000000e+00 : f32
    %132 = vector.broadcast %cst_24 : f32 to vector<2x128xf32>
    %133 = arith.subf %132, %125 : vector<2x128xf32>
    %134 = arith.mulf %133, %131 : vector<2x128xf32>
    %135 = arith.mulf %125, %106 : vector<2x128xf32>
    %136 = arith.addf %134, %135 : vector<2x128xf32>
    %c4 = arith.constant 4 : index
    %c0_25 = arith.constant 0 : index
    %137 = vector.load %arg7[%c4, %c0_25] : memref<16x128xf32, #tpu.memory_space<vmem>>, vector<2x128xf32>
    tpu.vector_store %arg7[%c4, %c0_25], %136 {strides = array<i32>} : memref<16x128xf32, #tpu.memory_space<vmem>>, vector<2x128xf32>,
    %cst_26 = arith.constant dense<0.000000e+00> : vector<2x256xf32>
    %138 = tpu.matmul %136, %1, %cst_26 {dimension_numbers = #tpu.dot_dimension_numbers<[1], [0], [0], [1], [0, 0, 1, 1], [], []>} : vector<2x128xf32>, vector<128x256xf32>, vector<2x256xf32> -> vector<2x256xf32>
    %139 = vector.extract_strided_slice %138 {offsets = [0, 0], sizes = [2, 128], strides = [1, 1]} : vector<2x256xf32> to vector<2x128xf32>
    %140 = vector.extract_strided_slice %138 {offsets = [0, 128], sizes = [2, 128], strides = [1, 1]} : vector<2x256xf32> to vector<2x128xf32>
    %c64_i32_27 = arith.constant 64 : i32
    %141 = tpu.dynamic_rotate %139 by %c64_i32_27 dim 1 : vector<2x128xf32>, i32 -> vector<2x128xf32>
    %142 = vector.extract_strided_slice %17 {offsets = [6, 0], sizes = [2, 128], strides = [1, 1]} : vector<16x128xf32> to vector<2x128xf32>
    %143 = arith.addf %142, %139 : vector<2x128xf32>
    %144 = arith.negf %143 : vector<2x128xf32>
    %145 = math.exp %144 : vector<2x128xf32>
    %cst_28 = arith.constant 1.000000e+00 : f32
    %146 = vector.broadcast %cst_28 : f32 to vector<2x128xf32>
    %147 = arith.addf %146, %145 : vector<2x128xf32>
    %148 = arith.divf %146, %147 : vector<2x128xf32>
    %149 = vector.extract_strided_slice %29 {offsets = [6, 0], sizes = [2, 128], strides = [1, 1]} : vector<16x128xf32> to vector<2x128xf32>
    %150 = arith.addf %149, %140 : vector<2x128xf32>
    %151 = arith.negf %150 : vector<2x128xf32>
    %152 = math.exp %151 : vector<2x128xf32>
    %cst_29 = arith.constant 1.000000e+00 : f32
    %153 = vector.broadcast %cst_29 : f32 to vector<2x128xf32>
    %154 = arith.addf %153, %152 : vector<2x128xf32>
    %155 = arith.divf %153, %154 : vector<2x128xf32>
    %156 = vector.extract_strided_slice %41 {offsets = [6, 0], sizes = [2, 128], strides = [1, 1]} : vector<16x128xf32> to vector<2x128xf32>
    %157 = vector.broadcast %42 : vector<1x128xf32> to vector<2x128xf32>
    %158 = arith.addf %141, %157 : vector<2x128xf32>
    %159 = arith.mulf %148, %158 : vector<2x128xf32>
    %160 = arith.addf %156, %159 : vector<2x128xf32>
    %161 = math.tanh %160 : vector<2x128xf32>
    %cst_30 = arith.constant 1.000000e+00 : f32
    %162 = vector.broadcast %cst_30 : f32 to vector<2x128xf32>
    %163 = arith.subf %162, %155 : vector<2x128xf32>
    %164 = arith.mulf %163, %161 : vector<2x128xf32>
    %165 = arith.mulf %155, %136 : vector<2x128xf32>
    %166 = arith.addf %164, %165 : vector<2x128xf32>
    %c6 = arith.constant 6 : index
    %c0_31 = arith.constant 0 : index
    %167 = vector.load %arg7[%c6, %c0_31] : memref<16x128xf32, #tpu.memory_space<vmem>>, vector<2x128xf32>
    tpu.vector_store %arg7[%c6, %c0_31], %166 {strides = array<i32>} : memref<16x128xf32, #tpu.memory_space<vmem>>, vector<2x128xf32>,
    %cst_32 = arith.constant dense<0.000000e+00> : vector<2x256xf32>
    %168 = tpu.matmul %166, %1, %cst_32 {dimension_numbers = #tpu.dot_dimension_numbers<[1], [0], [0], [1], [0, 0, 1, 1], [], []>} : vector<2x128xf32>, vector<128x256xf32>, vector<2x256xf32> -> vector<2x256xf32>
    %169 = vector.extract_strided_slice %168 {offsets = [0, 0], sizes = [2, 128], strides = [1, 1]} : vector<2x256xf32> to vector<2x128xf32>
    %170 = vector.extract_strided_slice %168 {offsets = [0, 128], sizes = [2, 128], strides = [1, 1]} : vector<2x256xf32> to vector<2x128xf32>
    %c64_i32_33 = arith.constant 64 : i32
    %171 = tpu.dynamic_rotate %169 by %c64_i32_33 dim 1 : vector<2x128xf32>, i32 -> vector<2x128xf32>
    %172 = vector.extract_strided_slice %17 {offsets = [8, 0], sizes = [2, 128], strides = [1, 1]} : vector<16x128xf32> to vector<2x128xf32>
    %173 = arith.addf %172, %169 : vector<2x128xf32>
    %174 = arith.negf %173 : vector<2x128xf32>
    %175 = math.exp %174 : vector<2x128xf32>
    %cst_34 = arith.constant 1.000000e+00 : f32
    %176 = vector.broadcast %cst_34 : f32 to vector<2x128xf32>
    %177 = arith.addf %176, %175 : vector<2x128xf32>
    %178 = arith.divf %176, %177 : vector<2x128xf32>
    %179 = vector.extract_strided_slice %29 {offsets = [8, 0], sizes = [2, 128], strides = [1, 1]} : vector<16x128xf32> to vector<2x128xf32>
    %180 = arith.addf %179, %170 : vector<2x128xf32>
    %181 = arith.negf %180 : vector<2x128xf32>
    %182 = math.exp %181 : vector<2x128xf32>
    %cst_35 = arith.constant 1.000000e+00 : f32
    %183 = vector.broadcast %cst_35 : f32 to vector<2x128xf32>
    %184 = arith.addf %183, %182 : vector<2x128xf32>
    %185 = arith.divf %183, %184 : vector<2x128xf32>
    %186 = vector.extract_strided_slice %41 {offsets = [8, 0], sizes = [2, 128], strides = [1, 1]} : vector<16x128xf32> to vector<2x128xf32>
    %187 = vector.broadcast %42 : vector<1x128xf32> to vector<2x128xf32>
    %188 = arith.addf %171, %187 : vector<2x128xf32>
    %189 = arith.mulf %178, %188 : vector<2x128xf32>
    %190 = arith.addf %186, %189 : vector<2x128xf32>
    %191 = math.tanh %190 : vector<2x128xf32>
    %cst_36 = arith.constant 1.000000e+00 : f32
    %192 = vector.broadcast %cst_36 : f32 to vector<2x128xf32>
    %193 = arith.subf %192, %185 : vector<2x128xf32>
    %194 = arith.mulf %193, %191 : vector<2x128xf32>
    %195 = arith.mulf %185, %166 : vector<2x128xf32>
    %196 = arith.addf %194, %195 : vector<2x128xf32>
    %c8 = arith.constant 8 : index
    %c0_37 = arith.constant 0 : index
    %197 = vector.load %arg7[%c8, %c0_37] : memref<16x128xf32, #tpu.memory_space<vmem>>, vector<2x128xf32>
    tpu.vector_store %arg7[%c8, %c0_37], %196 {strides = array<i32>} : memref<16x128xf32, #tpu.memory_space<vmem>>, vector<2x128xf32>,
    %cst_38 = arith.constant dense<0.000000e+00> : vector<2x256xf32>
    %198 = tpu.matmul %196, %1, %cst_38 {dimension_numbers = #tpu.dot_dimension_numbers<[1], [0], [0], [1], [0, 0, 1, 1], [], []>} : vector<2x128xf32>, vector<128x256xf32>, vector<2x256xf32> -> vector<2x256xf32>
    %199 = vector.extract_strided_slice %198 {offsets = [0, 0], sizes = [2, 128], strides = [1, 1]} : vector<2x256xf32> to vector<2x128xf32>
    %200 = vector.extract_strided_slice %198 {offsets = [0, 128], sizes = [2, 128], strides = [1, 1]} : vector<2x256xf32> to vector<2x128xf32>
    %c64_i32_39 = arith.constant 64 : i32
    %201 = tpu.dynamic_rotate %199 by %c64_i32_39 dim 1 : vector<2x128xf32>, i32 -> vector<2x128xf32>
    %202 = vector.extract_strided_slice %17 {offsets = [10, 0], sizes = [2, 128], strides = [1, 1]} : vector<16x128xf32> to vector<2x128xf32>
    %203 = arith.addf %202, %199 : vector<2x128xf32>
    %204 = arith.negf %203 : vector<2x128xf32>
    %205 = math.exp %204 : vector<2x128xf32>
    %cst_40 = arith.constant 1.000000e+00 : f32
    %206 = vector.broadcast %cst_40 : f32 to vector<2x128xf32>
    %207 = arith.addf %206, %205 : vector<2x128xf32>
    %208 = arith.divf %206, %207 : vector<2x128xf32>
    %209 = vector.extract_strided_slice %29 {offsets = [10, 0], sizes = [2, 128], strides = [1, 1]} : vector<16x128xf32> to vector<2x128xf32>
    %210 = arith.addf %209, %200 : vector<2x128xf32>
    %211 = arith.negf %210 : vector<2x128xf32>
    %212 = math.exp %211 : vector<2x128xf32>
    %cst_41 = arith.constant 1.000000e+00 : f32
    %213 = vector.broadcast %cst_41 : f32 to vector<2x128xf32>
    %214 = arith.addf %213, %212 : vector<2x128xf32>
    %215 = arith.divf %213, %214 : vector<2x128xf32>
    %216 = vector.extract_strided_slice %41 {offsets = [10, 0], sizes = [2, 128], strides = [1, 1]} : vector<16x128xf32> to vector<2x128xf32>
    %217 = vector.broadcast %42 : vector<1x128xf32> to vector<2x128xf32>
    %218 = arith.addf %201, %217 : vector<2x128xf32>
    %219 = arith.mulf %208, %218 : vector<2x128xf32>
    %220 = arith.addf %216, %219 : vector<2x128xf32>
    %221 = math.tanh %220 : vector<2x128xf32>
    %cst_42 = arith.constant 1.000000e+00 : f32
    %222 = vector.broadcast %cst_42 : f32 to vector<2x128xf32>
    %223 = arith.subf %222, %215 : vector<2x128xf32>
    %224 = arith.mulf %223, %221 : vector<2x128xf32>
    %225 = arith.mulf %215, %196 : vector<2x128xf32>
    %226 = arith.addf %224, %225 : vector<2x128xf32>
    %c10 = arith.constant 10 : index
    %c0_43 = arith.constant 0 : index
    %227 = vector.load %arg7[%c10, %c0_43] : memref<16x128xf32, #tpu.memory_space<vmem>>, vector<2x128xf32>
    tpu.vector_store %arg7[%c10, %c0_43], %226 {strides = array<i32>} : memref<16x128xf32, #tpu.memory_space<vmem>>, vector<2x128xf32>,
    %cst_44 = arith.constant dense<0.000000e+00> : vector<2x256xf32>
    %228 = tpu.matmul %226, %1, %cst_44 {dimension_numbers = #tpu.dot_dimension_numbers<[1], [0], [0], [1], [0, 0, 1, 1], [], []>} : vector<2x128xf32>, vector<128x256xf32>, vector<2x256xf32> -> vector<2x256xf32>
    %229 = vector.extract_strided_slice %228 {offsets = [0, 0], sizes = [2, 128], strides = [1, 1]} : vector<2x256xf32> to vector<2x128xf32>
    %230 = vector.extract_strided_slice %228 {offsets = [0, 128], sizes = [2, 128], strides = [1, 1]} : vector<2x256xf32> to vector<2x128xf32>
    %c64_i32_45 = arith.constant 64 : i32
    %231 = tpu.dynamic_rotate %229 by %c64_i32_45 dim 1 : vector<2x128xf32>, i32 -> vector<2x128xf32>
    %232 = vector.extract_strided_slice %17 {offsets = [12, 0], sizes = [2, 128], strides = [1, 1]} : vector<16x128xf32> to vector<2x128xf32>
    %233 = arith.addf %232, %229 : vector<2x128xf32>
    %234 = arith.negf %233 : vector<2x128xf32>
    %235 = math.exp %234 : vector<2x128xf32>
    %cst_46 = arith.constant 1.000000e+00 : f32
    %236 = vector.broadcast %cst_46 : f32 to vector<2x128xf32>
    %237 = arith.addf %236, %235 : vector<2x128xf32>
    %238 = arith.divf %236, %237 : vector<2x128xf32>
    %239 = vector.extract_strided_slice %29 {offsets = [12, 0], sizes = [2, 128], strides = [1, 1]} : vector<16x128xf32> to vector<2x128xf32>
    %240 = arith.addf %239, %230 : vector<2x128xf32>
    %241 = arith.negf %240 : vector<2x128xf32>
    %242 = math.exp %241 : vector<2x128xf32>
    %cst_47 = arith.constant 1.000000e+00 : f32
    %243 = vector.broadcast %cst_47 : f32 to vector<2x128xf32>
    %244 = arith.addf %243, %242 : vector<2x128xf32>
    %245 = arith.divf %243, %244 : vector<2x128xf32>
    %246 = vector.extract_strided_slice %41 {offsets = [12, 0], sizes = [2, 128], strides = [1, 1]} : vector<16x128xf32> to vector<2x128xf32>
    %247 = vector.broadcast %42 : vector<1x128xf32> to vector<2x128xf32>
    %248 = arith.addf %231, %247 : vector<2x128xf32>
    %249 = arith.mulf %238, %248 : vector<2x128xf32>
    %250 = arith.addf %246, %249 : vector<2x128xf32>
    %251 = math.tanh %250 : vector<2x128xf32>
    %cst_48 = arith.constant 1.000000e+00 : f32
    %252 = vector.broadcast %cst_48 : f32 to vector<2x128xf32>
    %253 = arith.subf %252, %245 : vector<2x128xf32>
    %254 = arith.mulf %253, %251 : vector<2x128xf32>
    %255 = arith.mulf %245, %226 : vector<2x128xf32>
    %256 = arith.addf %254, %255 : vector<2x128xf32>
    %c12 = arith.constant 12 : index
    %c0_49 = arith.constant 0 : index
    %257 = vector.load %arg7[%c12, %c0_49] : memref<16x128xf32, #tpu.memory_space<vmem>>, vector<2x128xf32>
    tpu.vector_store %arg7[%c12, %c0_49], %256 {strides = array<i32>} : memref<16x128xf32, #tpu.memory_space<vmem>>, vector<2x128xf32>,
    %cst_50 = arith.constant dense<0.000000e+00> : vector<2x256xf32>
    %258 = tpu.matmul %256, %1, %cst_50 {dimension_numbers = #tpu.dot_dimension_numbers<[1], [0], [0], [1], [0, 0, 1, 1], [], []>} : vector<2x128xf32>, vector<128x256xf32>, vector<2x256xf32> -> vector<2x256xf32>
    %259 = vector.extract_strided_slice %258 {offsets = [0, 0], sizes = [2, 128], strides = [1, 1]} : vector<2x256xf32> to vector<2x128xf32>
    %260 = vector.extract_strided_slice %258 {offsets = [0, 128], sizes = [2, 128], strides = [1, 1]} : vector<2x256xf32> to vector<2x128xf32>
    %c64_i32_51 = arith.constant 64 : i32
    %261 = tpu.dynamic_rotate %259 by %c64_i32_51 dim 1 : vector<2x128xf32>, i32 -> vector<2x128xf32>
    %262 = vector.extract_strided_slice %17 {offsets = [14, 0], sizes = [2, 128], strides = [1, 1]} : vector<16x128xf32> to vector<2x128xf32>
    %263 = arith.addf %262, %259 : vector<2x128xf32>
    %264 = arith.negf %263 : vector<2x128xf32>
    %265 = math.exp %264 : vector<2x128xf32>
    %cst_52 = arith.constant 1.000000e+00 : f32
    %266 = vector.broadcast %cst_52 : f32 to vector<2x128xf32>
    %267 = arith.addf %266, %265 : vector<2x128xf32>
    %268 = arith.divf %266, %267 : vector<2x128xf32>
    %269 = vector.extract_strided_slice %29 {offsets = [14, 0], sizes = [2, 128], strides = [1, 1]} : vector<16x128xf32> to vector<2x128xf32>
    %270 = arith.addf %269, %260 : vector<2x128xf32>
    %271 = arith.negf %270 : vector<2x128xf32>
    %272 = math.exp %271 : vector<2x128xf32>
    %cst_53 = arith.constant 1.000000e+00 : f32
    %273 = vector.broadcast %cst_53 : f32 to vector<2x128xf32>
    %274 = arith.addf %273, %272 : vector<2x128xf32>
    %275 = arith.divf %273, %274 : vector<2x128xf32>
    %276 = vector.extract_strided_slice %41 {offsets = [14, 0], sizes = [2, 128], strides = [1, 1]} : vector<16x128xf32> to vector<2x128xf32>
    %277 = vector.broadcast %42 : vector<1x128xf32> to vector<2x128xf32>
    %278 = arith.addf %261, %277 : vector<2x128xf32>
    %279 = arith.mulf %268, %278 : vector<2x128xf32>
    %280 = arith.addf %276, %279 : vector<2x128xf32>
    %281 = math.tanh %280 : vector<2x128xf32>
    %cst_54 = arith.constant 1.000000e+00 : f32
    %282 = vector.broadcast %cst_54 : f32 to vector<2x128xf32>
    %283 = arith.subf %282, %275 : vector<2x128xf32>
    %284 = arith.mulf %283, %281 : vector<2x128xf32>
    %285 = arith.mulf %275, %256 : vector<2x128xf32>
    %286 = arith.addf %284, %285 : vector<2x128xf32>
    %c14 = arith.constant 14 : index
    %c0_55 = arith.constant 0 : index
    %287 = vector.load %arg7[%c14, %c0_55] : memref<16x128xf32, #tpu.memory_space<vmem>>, vector<2x128xf32>
    tpu.vector_store %arg7[%c14, %c0_55], %286 {strides = array<i32>} : memref<16x128xf32, #tpu.memory_space<vmem>>, vector<2x128xf32>,
    %c0_56 = arith.constant 0 : index
    %c0_57 = arith.constant 0 : index
    %288 = vector.load %arg6[%c0_56, %c0_57] : memref<2x128xf32, #tpu.memory_space<vmem>>, vector<2x128xf32>
    tpu.vector_store %arg6[%c0_56, %c0_57], %286 {strides = array<i32>} : memref<2x128xf32, #tpu.memory_space<vmem>>, vector<2x128xf32>,
    %c0_58 = arith.constant 0 : index
    %c0_59 = arith.constant 0 : index
    %289 = vector.load %arg7[%c0_58, %c0_59] : memref<16x128xf32, #tpu.memory_space<vmem>>, vector<16x128xf32>
    %cst_60 = arith.constant dense<0.000000e+00> : vector<16x128xf32>
    %290 = tpu.matmul %289, %2, %cst_60 {dimension_numbers = #tpu.dot_dimension_numbers<[1], [0], [0], [1], [0, 0, 1, 1], [], []>} : vector<16x128xf32>, vector<128x128xf32>, vector<16x128xf32> -> vector<16x128xf32>
    %291 = vector.broadcast %5 : vector<16x1xf32> to vector<16x128xf32>
    %292 = vector.broadcast %44 : vector<1x128xf32> to vector<16x128xf32>
    %293 = arith.mulf %291, %292 : vector<16x128xf32>
    %294 = arith.addf %290, %293 : vector<16x128xf32>
    %295 = vector.broadcast %43 : vector<1x128xf32> to vector<16x128xf32>
    %296 = arith.addf %294, %295 : vector<16x128xf32>
    %cst_61 = arith.constant 0.000000e+00 : f32
    %297 = vector.broadcast %cst_61 : f32 to vector<16x128xf32>
    %298 = arith.maximumf %296, %297 : vector<16x128xf32>
    %299 = vector.broadcast %45 : vector<1x128xf32> to vector<16x128xf32>
    %300 = arith.mulf %298, %299 : vector<16x128xf32>
    %cst_62 = arith.constant dense<0.000000e+00> : vector<16xf32>
    %301 = vector.multi_reduction <add>, %300, %cst_62 [1] : vector<16x128xf32> to vector<16xf32>
    %302 = vector.shape_cast %301 : vector<16xf32> to vector<16x1xf32>
    %303 = vector.broadcast %46 : vector<1x1xf32> to vector<16x1xf32>
    %304 = arith.addf %302, %303 : vector<16x1xf32>
    %cst_63 = arith.constant 1.000000e-01 : f32
    %305 = vector.broadcast %cst_63 : f32 to vector<16x1xf32>
    %306 = arith.mulf %305, %304 : vector<16x1xf32>
    %307 = arith.addf %4, %306 : vector<16x1xf32>
    %c0_64 = arith.constant 0 : index
    %c0_65 = arith.constant 0 : index
    %308 = vector.load %arg5[%c0_64, %c0_65] : memref<16x1xf32, #tpu.memory_space<vmem>>, vector<16x1xf32>
    tpu.vector_store %arg5[%c0_64, %c0_65], %307 {strides = array<i32>} : memref<16x1xf32, #tpu.memory_space<vmem>>, vector<16x1xf32>,
    return
  }
}

</mosaic_0001>

<bundles_post_ra>
// kernel: tpu_custom_call.1
= control target key start
LH: loop header
LB: loop body
LE: loop exit
PB: predicated region body
PF: predicated region fallthrough
CT: control target
= control target key end

     0   :  { %12 = vsyncpa [#allocation4], 0  ;;  %s1987_s0 = inlined_call_operand.vmem [shape: f32[16,2], index: 0, kind: input, shape index: {}]   ;;  %s1988_s1 = inlined_call_operand.vmem [shape: f32[2,128], index: 1, kind: input, shape index: {}]   ;;  %s1989_s2 = inlined_call_operand.hbm [shape: f32[128,256], index: 2, kind: input, shape index: {}]   ;;  %s1990_s3 = inlined_call_operand.hbm [shape: f32[128,128], index: 3, kind: input, shape index: {}]   ;;  %s1991_s4 = inlined_call_operand.vmem [shape: f32[16,128], index: 4, kind: input, shape index: {}]   ;;  %s1992_s5 = inlined_call_operand.vmem [shape: f32[16,1], index: 5, kind: output, shape index: {0}]   ;;  %s1993_s6 = inlined_call_operand.hbm [shape: f32[2,128], index: 6, kind: output, shape index: {1}]  }
   0x1   :  { %13 = vsyncpa [#allocation7], 0 }
   0x2   :  { %14 = vsyncpa [#allocation5], 0  ;;  %s1402_s21 = smov [#allocation3]  }
   0x3   :  { %s24_s22 = sshll.u32 %s1402_s21, 4  ;;  %s25_s22 = int_to_ptr.vmem [resolvable:$true] %s24_s22 }
   0x4   :  { %s1344_s23 = scalar_lea.vmem %s25_s22, 4096  ;;  %p1349_p1 = scmp.lt.s32.totalorder %s25_s22, %s25_s22 }
   0x5   :  { %p1345_p0 = scmp.ne.s32.totalorder %s25_s22, %s1344_s23  ;;  %p1350_p2 = scmp.lt.s32.totalorder %s1344_s23, %s1344_s23 }
   0x7   :  { %p1351_p3 = por %p1350_p2, %p1349_p1 }
   0x9   :  { %p1352_p4 = pnand %p1351_p3, %p1345_p0 }
   0xb   :  { %1355 = shalt.err (!%p1352_p4)
}
   0xc   :  { %s1403_s24 = smov 256   ;;  %s1404_s25 = smov 16  }
   0xd   :  { %30 = dma.hbm_to_vmem [thread:$0]  %s1989_s2, 4096, %s25_s22, [#allocation4], %s1403_s24, %s1403_s24, %s1404_s25  }
   0xe   :  { %s1405_s28 = smov [#allocation6]  }
   0xf   :  { %s36_s29 = sshll.u32 %s1405_s28, 4  ;;  %s37_s29 = int_to_ptr.vmem [resolvable:$true] %s36_s29 }
  0x10   :  { %s1364_s30 = scalar_lea.vmem %s37_s29, 2048  ;;  %p1369_p6 = scmp.lt.s32.totalorder %s37_s29, %s37_s29 }
  0x11   :  { %p1365_p5 = scmp.ne.s32.totalorder %s37_s29, %s1364_s30  ;;  %p1370_p7 = scmp.lt.s32.totalorder %s1364_s30, %s1364_s30 }
  0x13   :  { %p1371_p8 = por %p1370_p7, %p1369_p6 }
  0x15   :  { %p1372_p9 = pnand %p1371_p8, %p1365_p5 }
  0x17   :  { %1375 = shalt.err (!%p1372_p9)
}
  0x18   :  { %s1406_s7 = smov 128   ;;  %s1407_s8 = smov 8  }
  0x19   :  { %42 = dma.hbm_to_vmem [thread:$0]  %s1990_s3, 2048, %s37_s29, [#allocation7], %s1406_s7, %s1406_s7, %s1407_s8  }
  0x1a   :  { %1396 = dma.done.wait [#allocation4], 4096  }
  0x1b   :  { %1397 = vsyncadd [#allocation4], 4294963200 }
  0x1c   :  { %1398 = dma.done.wait [#allocation7], 2048  }
  0x1d   :  { %1399 = vsyncadd [#allocation7], 4294965248  ;;  %v1998_v0 = vmov 0.0   ;;  %v1409_v1 = vmov 0   ;;  %v1456_v2 = vld [vmem:[#allocation3 + $0xf8] sm:$0xff]  ;;  %v1458_v3 = vld [vmem:[#allocation3 + $0xf0] sm:$0xff]  ;;  %v113_v38 = vlaneseq }
  0x1e   :  { %246 = vmatprep.mubr.f32.mxu0 %v1998_v0  ;;  %1252 = vset.pattern.permute.xlu0 %v1409_v1  ;;  %v1460_v4 = vld [vmem:[#allocation3 + $0xe8] sm:$0xff]  ;;  %v1463_v5 = vld [vmem:[#allocation3 + $0xe0] sm:$0xff]  ;;  %v1467_v6 = vld [vmem:[#allocation3 + $0xd8] sm:$0xff]  ;;  %v1410_v22 = vmov 1   ;;  %s1412_s18 = smov [#allocation8]  }
  0x1f   :  { %346 = vmatprep.mubr.f32.mxu1 %v1998_v0  ;;  %1254 = vset.pattern.permute.xlu1 %v1409_v1  ;;  %v1471_v7 = vld [vmem:[#allocation3 + $0xd0] sm:$0xff]  ;;  %v1475_v8 = vld [vmem:[#allocation3 + $0xc8] sm:$0xff]  ;;  %v1479_v9 = vld [vmem:[#allocation3 + $0xc0] sm:$0xff]  ;;  %v1629_v39 = vshrl.u32 %v113_v38, 7  ;;  %s1160_s19 = sshll.u32 %s1412_s18, 4  ;;  %s1161_s19 = int_to_ptr.vmem [resolvable:$true] %s1160_s19 }
  0x20   :  { %182 = vmatprep.subr.mxu0 %v1456_v2  ;;  %282 = vmatprep.subr.mxu1 %v1456_v2  ;;  %v1483_v10 = vld [vmem:[#allocation3 + $0xb8] sm:$0xff]  ;;  %v1487_v11 = vld [vmem:[#allocation3 + $0xb0] sm:$0xff]  ;;  %v1491_v12 = vld [vmem:[#allocation3 + $0xa8] sm:$0xff]  ;;  %s1376_s20 = scalar_lea.vmem %s1161_s19, 32  ;;  %p1381_p11 = scmp.lt.s32.totalorder %s1161_s19, %s1161_s19 }
  0x21   :  { %183 = vmatpush1.msra.mxu0 %v1458_v3  ;;  %283 = vmatpush1.msra.mxu1 %v1458_v3  ;;  %v1495_v13 = vld [vmem:[#allocation3 + $0xa0] sm:$0xff]  ;;  %v1499_v14 = vld [vmem:[#allocation3 + $0x98] sm:$0xff]  ;;  %v1503_v15 = vld [vmem:[#allocation3 + $0x90] sm:$0xff]  ;;  %v115_v41 = vsub.s32 0, %v1629_v39  ;;  %v1997_v42 = vsub.s32 3, %v1629_v39  ;;  %v137_v49 = vsub.s32 6, %v1629_v39  ;;  %p1377_p10 = scmp.ne.s32.totalorder %s1161_s19, %s1376_s20  ;;  %p1382_p12 = scmp.lt.s32.totalorder %s1376_s20, %s1376_s20 }
  0x22   :  { %184 = vmatprep.subr.mxu0 %v1460_v4  ;;  %284 = vmatprep.subr.mxu1 %v1460_v4  ;;  %v51_v16 = vld [vmem:[%s1987_s0] sm:$0xff]  ;;  %v1510_v17 = vld [vmem:[#allocation3 + $0x88] sm:$0xff]  ;;  %v1513_v18 = vld [vmem:[#allocation3 + $0x80] sm:$0xff]  ;;  %v143_v52 = vsub.s32 1, %v1629_v39  ;;  %v1995_v53 = vsub.s32 4, %v1629_v39  ;;  %v157_v60 = vsub.s32 7, %v1629_v39 }
  0x23   :  { %185 = vmatpush1.msra.mxu0 %v1463_v5  ;;  %285 = vmatpush1.msra.mxu1 %v1463_v5  ;;  %v1516_v19 = vld [vmem:[#allocation3 + $0x78] sm:$0xff]  ;;  %v1520_v20 = vld [vmem:[#allocation3 + $0x70] sm:$0xff]  ;;  %v1524_v21 = vld [vmem:[#allocation3 + $0x68] sm:$0xff]  ;;  %p1383_p13 = por %p1382_p12, %p1381_p11 }
  0x24   :  { %186 = vmatprep.subr.mxu0 %v1467_v6  ;;  %286 = vmatprep.subr.mxu1 %v1467_v6  ;;  %v1527_v23 = vld [vmem:[#allocation3 + $0x60] sm:$0xff]  ;;  %v1530_v24 = vld [vmem:[#allocation3 + $0x58] sm:$0xff]  ;;  %v1534_v25 = vld [vmem:[#allocation3 + $0x50] sm:$0xff] }
  0x25   :  { %187 = vmatpush1.msra.mxu0 %v1471_v7  ;;  %287 = vmatpush1.msra.mxu1 %v1471_v7  ;;  %v1538_v26 = vld [vmem:[#allocation3 + $0x48] sm:$0xff]  ;;  %v1542_v27 = vld [vmem:[#allocation3 + $0x40] sm:$0xff]  ;;  %v1546_v28 = vld [vmem:[#allocation3 + $0x38] sm:$0xff]  ;;  %p1384_p0 = pnand %p1383_p13, %p1377_p10 }
  0x26   :  { %188 = vmatprep.subr.mxu0 %v1475_v8  ;;  %288 = vmatprep.subr.mxu1 %v1475_v8  ;;  %v1550_v29 = vld [vmem:[#allocation3 + $0x30] sm:$0xff]  ;;  %v1554_v30 = vld [vmem:[#allocation3 + $0x28] sm:$0xff]  ;;  %v1558_v31 = vld [vmem:[#allocation3 + $0x20] sm:$0xff] }
  0x27   :  { %189 = vmatpush1.msra.mxu0 %v1479_v9  ;;  %289 = vmatpush1.msra.mxu1 %v1479_v9  ;;  %v1562_v32 = vld [vmem:[#allocation3 + $0x18] sm:$0xff]  ;;  %v1566_v33 = vld [vmem:[#allocation3 + $0x10] sm:$0xff]  ;;  %v1570_v34 = vld [vmem:[#allocation3 + $0x8] sm:$0xff] }
  0x28   :  { %190 = vmatprep.subr.mxu0 %v1483_v10  ;;  %290 = vmatprep.subr.mxu1 %v1483_v10  ;;  %v1574_v35 = vld [vmem:[#allocation3] sm:$0xff]  ;;  %v1581_v36 = vld [vmem:[%s1988_s1] sm:$0x3]  ;;  %s1411_s1 = smov 64  }
  0x29   :  { %191 = vmatpush1.msra.mxu0 %v1487_v11  ;;  %291 = vmatpush1.msra.mxu1 %v1487_v11  ;;  %v101_v43 = vld [vmem:[%s1991_s4] sm:$0xff] }
  0x2a   :  { %192 = vmatprep.subr.mxu0 %v1491_v12  ;;  %292 = vmatprep.subr.mxu1 %v1491_v12  ;;  %v1636_v44 = vrot.slane %v101_v43, %v115_v41  ;;  %v1640_v45 = vrot.slane %v101_v43, %v1997_v42  ;;  %v1648_v51 = vrot.slane %v101_v43, %v137_v49  ;;  %v1994_v49 = vsub.s32 5, %v1629_v39 }
  0x2b   :  { %193 = vmatpush1.msra.mxu0 %v1495_v13  ;;  %105 = vperm.xlu0 %1252, %v51_v16   ;;  %v1655_v55 = vrot.slane %v101_v43, %v143_v52  ;;  %v1659_v56 = vrot.slane %v101_v43, %v1995_v53  ;;  %v1666_v63 = vrot.slane %v101_v43, %v157_v60 }
  0x2c   :  { %194 = vmatprep.subr.mxu0 %v1499_v14  ;;  %293 = vmatpush1.msra.mxu1 %v1495_v13 }
  0x2d   :  { %195 = vmatpush1.msra.mxu0 %v1503_v15  ;;  %294 = vmatprep.subr.mxu1 %v1499_v14 }
  0x2e   :  { %196 = vmatprep.subr.mxu0 %v1510_v17  ;;  %295 = vmatpush1.msra.mxu1 %v1503_v15 }
  0x2f   :  { %197 = vmatpush1.msra.mxu0 %v1513_v18  ;;  %1253 = vset.pattern.permute.xlu0 %v1410_v22 }
  0x30   :  { %198 = vmatprep.subr.mxu0 %v1516_v19  ;;  %120 = vperm.xlu0 %1253, %v51_v16  }
  0x31   :  { %199 = vmatpush1.msra.mxu0 %v1520_v20  ;;  %296 = vmatprep.subr.mxu1 %v1510_v17 }
  0x32   :  { %200 = vmatprep.subr.mxu0 %v1524_v21  ;;  %297 = vmatpush1.msra.mxu1 %v1513_v18 }
  0x33   :  { %201 = vmatpush1.msra.mxu0 %v1527_v23  ;;  %298 = vmatprep.subr.mxu1 %v1516_v19 }
  0x34   :  { %202 = vmatprep.subr.mxu0 %v1530_v24  ;;  %299 = vmatpush1.msra.mxu1 %v1520_v20 }
  0x35   :  { %203 = vmatpush1.msra.mxu0 %v1534_v25  ;;  %300 = vmatprep.subr.mxu1 %v1524_v21 }
  0x36   :  { %204 = vmatprep.subr.mxu0 %v1538_v26  ;;  %301 = vmatpush1.msra.mxu1 %v1527_v23 }
  0x37   :  { %205 = vmatpush1.msra.mxu0 %v1542_v27  ;;  %302 = vmatprep.subr.mxu1 %v1530_v24 }
  0x38   :  { %206 = vmatprep.subr.mxu0 %v1546_v28  ;;  %303 = vmatpush1.msra.mxu1 %v1534_v25 }
  0x39   :  { %207 = vmatpush1.msra.mxu0 %v1550_v29  ;;  %304 = vmatprep.subr.mxu1 %v1538_v26 }
  0x3a   :  { %208 = vmatprep.subr.mxu0 %v1554_v30  ;;  %305 = vmatpush1.msra.mxu1 %v1542_v27 }
  0x3b   :  { %209 = vmatpush1.msra.mxu0 %v1558_v31  ;;  %306 = vmatprep.subr.mxu1 %v1546_v28 }
  0x3c   :  { %210 = vmatprep.subr.mxu0 %v1562_v32  ;;  %307 = vmatpush1.msra.mxu1 %v1550_v29 }
  0x3d   :  { %211 = vmatpush1.msra.mxu0 %v1566_v33  ;;  %308 = vmatprep.subr.mxu1 %v1554_v30 }
  0x3e   :  { %212 = vmatprep.subr.mxu0 %v1570_v34  ;;  %309 = vmatpush1.msra.mxu1 %v1558_v31 }
  0x3f   :  { %213 = vmatpush1.msra.mxu0 %v1574_v35  ;;  %310 = vmatprep.subr.mxu1 %v1562_v32 }
  0x40   :  { %247 = vmatmul.mubr.f32.vlgmr.msra.gmra.mxu0 %v1581_v36  ;;  %311 = vmatpush1.msra.mxu1 %v1566_v33 }
  0x41   :  { %393 = vmatprep.subr.mxu0 %v1456_v2  ;;  %312 = vmatprep.subr.mxu1 %v1570_v34 }
  0x42   :  { %394 = vmatpush1.msra.mxu0 %v1458_v3  ;;  %313 = vmatpush1.msra.mxu1 %v1574_v35 }
  0x43   :  { %395 = vmatprep.subr.mxu0 %v1460_v4  ;;  %457 = vmatprep.mubr.f32.mxu0 %v1998_v0 }
  0x44   :  { %396 = vmatpush1.msra.mxu0 %v1463_v5  ;;  %503 = vmatprep.subr.mxu1 %v1456_v2 }
  0x45   :  { %397 = vmatprep.subr.mxu0 %v1467_v6 }
  0x46   :  { %398 = vmatpush1.msra.mxu0 %v1471_v7 }
  0x47   :  { %399 = vmatprep.subr.mxu0 %v1475_v8 }
  0x48   :  { %400 = vmatpush1.msra.mxu0 %v1479_v9 }
  0x49   :  { %401 = vmatprep.subr.mxu0 %v1483_v10 }
  0x4a   :  { %402 = vmatpush1.msra.mxu0 %v1487_v11 }
  0x4b   :  { %403 = vmatprep.subr.mxu0 %v1491_v12 }
  0x4c   :  { %404 = vmatpush1.msra.mxu0 %v1495_v13 }
  0x4d   :  { %405 = vmatprep.subr.mxu0 %v1499_v14 }
  0x4e   :  { %406 = vmatpush1.msra.mxu0 %v1503_v15 }
  0x4f   :  { %407 = vmatprep.subr.mxu0 %v1510_v17 }
  0x50   :  { %408 = vmatpush1.msra.mxu0 %v1513_v18 }
  0x51   :  { %409 = vmatprep.subr.mxu0 %v1516_v19 }
  0x52   :  { %410 = vmatpush1.msra.mxu0 %v1520_v20 }
  0x53   :  { %411 = vmatprep.subr.mxu0 %v1524_v21 }
  0x54   :  { %412 = vmatpush1.msra.mxu0 %v1527_v23 }
  0x55   :  { %413 = vmatprep.subr.mxu0 %v1530_v24 }
  0x56   :  { %414 = vmatpush1.msra.mxu0 %v1534_v25 }
  0x57   :  { %415 = vmatprep.subr.mxu0 %v1538_v26 }
  0x58   :  { %416 = vmatpush1.msra.mxu0 %v1542_v27 }
  0x59   :  { %417 = vmatprep.subr.mxu0 %v1546_v28 }
  0x5a   :  { %418 = vmatpush1.msra.mxu0 %v1550_v29 }
  0x5b   :  { %419 = vmatprep.subr.mxu0 %v1554_v30 }
  0x5c   :  { %420 = vmatpush1.msra.mxu0 %v1558_v31 }
  0x5d   :  { %421 = vmatprep.subr.mxu0 %v1562_v32 }
  0x5e   :  { %422 = vmatpush1.msra.mxu0 %v1566_v33 }
  0x5f   :  { %423 = vmatprep.subr.mxu0 %v1570_v34 }
  0x60   :  { %424 = vmatpush1.msra.mxu0 %v1574_v35 }
  0x61   :  { %613 = vmatprep.subr.mxu0 %v1456_v2 }
  0xa6   :  { %v106_v40 = vpop.permute.xlu0 %105 }
  0xa7   :  { %v117_v47 = vmul.f32 %v1636_v44, %v106_v40  ;;  %v145_v58 = vmul.f32 %v1655_v55, %v106_v40 }
  0xab   :  { %v1642_v46 = vpop.permute.xlu0 %120 }
  0xac   :  { %2001 = vst [vmem:[#allocation12_spill] sm:$0xff] %v1642_v46  ;;  %v131_v48 = vmul.f32 %v1640_v45, %v1642_v46  ;;  %v151_v59 = vmul.f32 %v1659_v56, %v1642_v46 }
  0xae   :  { %v133_v50 = vadd.f32 %v131_v48, %v117_v47  ;;  %v153_v62 = vadd.f32 %v151_v59, %v145_v58  ;;  %v1996_v48 = vsub.s32 2, %v1629_v39 }
  0xb0   :  { %v1653_v54 = vadd.f32 %v1648_v51, %v133_v50  ;;  %v1669_v1 = vadd.f32 %v1666_v63, %v153_v62  ;;  %v1676_v50 = vrot.slane %v101_v43, %v1996_v48 }
  0xb2   :  { %v165_v58 = vmul.f32 %v1676_v50, %v106_v40 }
 0x100   :  { %v248_v37 = vpop.f32.mrf.mxu0 }
 0x101   :  { %253 = vrot.lane.b32.xlu1 %v248_v37, %s1411_s1  ;;  %v255_v57 = vadd.f32 %v248_v37, %v1653_v54 }
 0x102   :  { %v250_v16 = vpop.f32.mrf.mxu0 }
 0x103   :  { %v1172_v61 = vmul.f32 -1.442695, %v255_v57  ;;  %v262_v22 = vadd.f32 %v250_v16, %v1669_v1  ;;  %v1680_v57 = vrot.slane %v101_v43, %v1994_v49 }
 0x105   :  { %1255 = vpow2.f32 %v1172_v61  ;;  %v1173_v38 = vmul.f32 -1.442695, %v262_v22  ;;  %v171_v59 = vmul.f32 %v1680_v57, %v1642_v46  ;;  %v1688_v61 = vld [vmem:[%s1991_s4 + $0x8] sm:$0xff] }
 0x106   :  { %v1691_v62 = vrot.slane %v1688_v61, %v143_v52  ;;  %v1694_v16 = vrot.slane %v1688_v61, %v115_v41 }
 0x107   :  { %1257 = vpow2.f32 %v1173_v38  ;;  %v173_v22 = vadd.f32 %v171_v59, %v165_v58  ;;  %v2002_v59 = vmov 0.0  }
 0x112   :  { %v1256_v37 = vpop.eup %1255 }
 0x113   :  { %v259_v47 = vadd.f32 1.0, %v1256_v37 }
 0x114   :  { %v1258_v60 = vpop.eup %1257 }
 0x115   :  { %1259 = vrcp.f32 %v259_v47  ;;  %v266_v43 = vadd.f32 1.0, %v1258_v60  ;;  %v1698_v47 = vadd.f32 %v1694_v16, %v173_v22 }
 0x117   :  { %1261 = vrcp.f32 %v266_v43 }
 0x122   :  { %v1260_v37 = vpop.eup %1259 }
 0x124   :  { %v1262_v48 = vpop.eup %1261 }
 0x125   :  { %v277_v52 = vsub.f32 1.0, %v1262_v48  ;;  %v279_v41 = vmul.f32 %v1262_v48, %v1581_v36 }
 0x173   :  { %v254_v38 = vpop.permute.xlu1 %253 }
 0x174   :  { %v273_v40 = vadd.f32 %v1691_v62, %v254_v38 }
 0x176   :  { %v274_v49 = vmul.f32 %v1260_v37, %v273_v40 }
 0x178   :  { %v275_v53 = vadd.f32 %v274_v49, %v1698_v47 }
 0x17a   :  { %1263 = vtanh.f32 %v275_v53 }
 0x187   :  { %v1264_v42 = vpop.eup %1263 }
 0x188   :  { %v278_v0 = vmul.f32 %v1264_v42, %v277_v52 }
 0x18a   :  { %v1702_v58 = vadd.f32 %v279_v41, %v278_v0 }
 0x18c   :  { %281 = vst [vmem:[#allocation2] sm:$0x3] %v1702_v58  ;;  %347 = vmatmul.mubr.f32.vlgmr.msra.gmra.mxu1 %v1702_v58 }
 0x18d   :  { %504 = vmatpush1.msra.mxu1 %v1458_v3  ;;  %567 = vmatprep.mubr.f32.mxu1 %v2002_v59 }
 0x18e   :  { %505 = vmatprep.subr.mxu1 %v1460_v4 }
 0x18f   :  { %506 = vmatpush1.msra.mxu1 %v1463_v5 }
 0x190   :  { %507 = vmatprep.subr.mxu1 %v1467_v6 }
 0x191   :  { %508 = vmatpush1.msra.mxu1 %v1471_v7 }
 0x192   :  { %509 = vmatprep.subr.mxu1 %v1475_v8 }
 0x193   :  { %510 = vmatpush1.msra.mxu1 %v1479_v9 }
 0x194   :  { %511 = vmatprep.subr.mxu1 %v1483_v10 }
 0x195   :  { %512 = vmatpush1.msra.mxu1 %v1487_v11 }
 0x196   :  { %513 = vmatprep.subr.mxu1 %v1491_v12 }
 0x197   :  { %514 = vmatpush1.msra.mxu1 %v1495_v13 }
 0x198   :  { %515 = vmatprep.subr.mxu1 %v1499_v14 }
 0x199   :  { %516 = vmatpush1.msra.mxu1 %v1503_v15 }
 0x19a   :  { %517 = vmatprep.subr.mxu1 %v1510_v17 }
 0x19b   :  { %518 = vmatpush1.msra.mxu1 %v1513_v18 }
 0x19c   :  { %519 = vmatprep.subr.mxu1 %v1516_v19 }
 0x19d   :  { %520 = vmatpush1.msra.mxu1 %v1520_v20 }
 0x19e   :  { %521 = vmatprep.subr.mxu1 %v1524_v21 }
 0x19f   :  { %522 = vmatpush1.msra.mxu1 %v1527_v23 }
 0x1a0   :  { %523 = vmatprep.subr.mxu1 %v1530_v24 }
 0x1a1   :  { %524 = vmatpush1.msra.mxu1 %v1534_v25 }
 0x1a2   :  { %525 = vmatprep.subr.mxu1 %v1538_v26 }
 0x1a3   :  { %526 = vmatpush1.msra.mxu1 %v1542_v27 }
 0x1a4   :  { %527 = vmatprep.subr.mxu1 %v1546_v28 }
 0x1a5   :  { %528 = vmatpush1.msra.mxu1 %v1550_v29 }
 0x1a6   :  { %529 = vmatprep.subr.mxu1 %v1554_v30 }
 0x1a7   :  { %530 = vmatpush1.msra.mxu1 %v1558_v31 }
 0x1a8   :  { %531 = vmatprep.subr.mxu1 %v1562_v32 }
 0x1a9   :  { %532 = vmatpush1.msra.mxu1 %v1566_v33 }
 0x1aa   :  { %533 = vmatprep.subr.mxu1 %v1570_v34 }
 0x1ab   :  { %534 = vmatpush1.msra.mxu1 %v1574_v35 }
 0x1ac   :  { %709 = vmatprep.subr.mxu1 %v1456_v2 }
 0x24c   :  { %v348_v0 = vpop.f32.mrf.mxu1 }
 0x24d   :  { %353 = vrot.lane.b32.xlu1 %v348_v0, %s1411_s1  ;;  %v356_v36 = vrot.slane %v348_v0, 6 }
 0x24e   :  { %v350_v48 = vpop.f32.mrf.mxu1 }
 0x24f   :  { %v358_v42 = vadd.f32 %v356_v36, %v1653_v54  ;;  %v366_v49 = vrot.slane %v350_v48, 6  ;;  %v385_v48 = vrot.slane %v1702_v58, 6 }
 0x251   :  { %v1174_v53 = vmul.f32 -1.442695, %v358_v42  ;;  %v368_v60 = vadd.f32 %v366_v49, %v1669_v1 }
 0x253   :  { %1265 = vpow2.f32 %v1174_v53  ;;  %v1175_v22 = vmul.f32 -1.442695, %v368_v60 }
 0x255   :  { %1267 = vpow2.f32 %v1175_v22 }
 0x260   :  { %v1266_v43 = vpop.eup %1265 }
 0x261   :  { %v362_v38 = vadd.f32 1.0, %v1266_v43 }
 0x262   :  { %v1268_v40 = vpop.eup %1267 }
 0x263   :  { %1269 = vrcp.f32 %v362_v38  ;;  %v372_v52 = vadd.f32 1.0, %v1268_v40 }
 0x265   :  { %1271 = vrcp.f32 %v372_v52 }
 0x270   :  { %v1270_v0 = vpop.eup %1269 }
 0x272   :  { %v1272_v53 = vpop.eup %1271 }
 0x273   :  { %v382_v49 = vsub.f32 1.0, %v1272_v53  ;;  %v387_v43 = vmul.f32 %v1272_v53, %v385_v48 }
 0x2bf   :  { %v354_v37 = vpop.permute.xlu1 %353 }
 0x2c0   :  { %v375_v41 = vadd.f32 %v354_v37, %v1691_v62 }
 0x2c2   :  { %v377_v46 = vrot.slane %v375_v41, 6 }
 0x2c4   :  { %v379_v36 = vmul.f32 %v1270_v0, %v377_v46 }
 0x2c6   :  { %v380_v42 = vadd.f32 %v379_v36, %v1698_v47 }
 0x2c8   :  { %1273 = vtanh.f32 %v380_v42 }
 0x2d5   :  { %v1274_v60 = vpop.eup %1273 }
 0x2d6   :  { %v383_v22 = vmul.f32 %v1274_v60, %v382_v49 }
 0x2d8   :  { %v1745_v38 = vadd.f32 %v387_v43, %v383_v22 }
 0x2da   :  { %389 = vst [vmem:[#allocation2] sm:$0xc] %v1745_v38  ;;  %v391_v40 = vrot.slane %v1745_v38, 2 }
 0x2dc   :  { %458 = vmatmul.mubr.f32.vlgmr.msra.gmra.mxu0 %v391_v40 }
 0x2dd   :  { %614 = vmatpush1.msra.mxu0 %v1458_v3  ;;  %677 = vmatprep.mubr.f32.mxu0 %v2002_v59 }
 0x2de   :  { %615 = vmatprep.subr.mxu0 %v1460_v4 }
 0x2df   :  { %616 = vmatpush1.msra.mxu0 %v1463_v5 }
 0x2e0   :  { %617 = vmatprep.subr.mxu0 %v1467_v6 }
 0x2e1   :  { %618 = vmatpush1.msra.mxu0 %v1471_v7 }
 0x2e2   :  { %619 = vmatprep.subr.mxu0 %v1475_v8 }
 0x2e3   :  { %620 = vmatpush1.msra.mxu0 %v1479_v9 }
 0x2e4   :  { %621 = vmatprep.subr.mxu0 %v1483_v10 }
 0x2e5   :  { %622 = vmatpush1.msra.mxu0 %v1487_v11 }
 0x2e6   :  { %623 = vmatprep.subr.mxu0 %v1491_v12 }
 0x2e7   :  { %624 = vmatpush1.msra.mxu0 %v1495_v13 }
 0x2e8   :  { %625 = vmatprep.subr.mxu0 %v1499_v14 }
 0x2e9   :  { %626 = vmatpush1.msra.mxu0 %v1503_v15 }
 0x2ea   :  { %627 = vmatprep.subr.mxu0 %v1510_v17 }
 0x2eb   :  { %628 = vmatpush1.msra.mxu0 %v1513_v18 }
 0x2ec   :  { %629 = vmatprep.subr.mxu0 %v1516_v19 }
 0x2ed   :  { %630 = vmatpush1.msra.mxu0 %v1520_v20 }
 0x2ee   :  { %631 = vmatprep.subr.mxu0 %v1524_v21 }
 0x2ef   :  { %632 = vmatpush1.msra.mxu0 %v1527_v23 }
 0x2f0   :  { %633 = vmatprep.subr.mxu0 %v1530_v24 }
 0x2f1   :  { %634 = vmatpush1.msra.mxu0 %v1534_v25 }
 0x2f2   :  { %635 = vmatprep.subr.mxu0 %v1538_v26 }
 0x2f3   :  { %636 = vmatpush1.msra.mxu0 %v1542_v27 }
 0x2f4   :  { %637 = vmatprep.subr.mxu0 %v1546_v28 }
 0x2f5   :  { %638 = vmatpush1.msra.mxu0 %v1550_v29 }
 0x2f6   :  { %639 = vmatprep.subr.mxu0 %v1554_v30 }
 0x2f7   :  { %640 = vmatpush1.msra.mxu0 %v1558_v31 }
 0x2f8   :  { %641 = vmatprep.subr.mxu0 %v1562_v32 }
 0x2f9   :  { %642 = vmatpush1.msra.mxu0 %v1566_v33 }
 0x2fa   :  { %643 = vmatprep.subr.mxu0 %v1570_v34 }
 0x2fb   :  { %644 = vmatpush1.msra.mxu0 %v1574_v35 }
 0x2fc   :  { %820 = vmatprep.subr.mxu0 %v1456_v2 }
 0x39c   :  { %v459_v46 = vpop.f32.mrf.mxu0 }
 0x39d   :  { %464 = vrot.lane.b32.xlu1 %v459_v46, %s1411_s1  ;;  %v467_v58 = vrot.slane %v459_v46, 4 }
 0x39e   :  { %v461_v41 = vpop.f32.mrf.mxu0 }
 0x39f   :  { %v469_v37 = vadd.f32 %v467_v58, %v1653_v54  ;;  %v477_v0 = vrot.slane %v461_v41, 4 }
 0x3a1   :  { %v1176_v52 = vmul.f32 -1.442695, %v469_v37  ;;  %v479_v36 = vadd.f32 %v477_v0, %v1669_v1  ;;  %v495_v0 = vrot.slane %v1745_v38, 6  ;;  %v1828_v38 = vld [vmem:[%s1987_s0 + $0x8] sm:$0xff] }
 0x3a2   :  { %110 = vperm.xlu1 %1254, %v1828_v38  }
 0x3a3   :  { %1275 = vpow2.f32 %v1176_v52  ;;  %v1177_v42 = vmul.f32 -1.442695, %v479_v36 }
 0x3a5   :  { %1277 = vpow2.f32 %v1177_v42 }
 0x3b0   :  { %v1276_v53 = vpop.eup %1275 }
 0x3b1   :  { %v473_v48 = vadd.f32 1.0, %v1276_v53 }
 0x3b2   :  { %v1278_v49 = vpop.eup %1277 }
 0x3b3   :  { %1279 = vrcp.f32 %v473_v48  ;;  %v483_v22 = vadd.f32 1.0, %v1278_v49 }
 0x3b5   :  { %1281 = vrcp.f32 %v483_v22 }
 0x3c0   :  { %v1280_v46 = vpop.eup %1279 }
 0x3c2   :  { %v1282_v52 = vpop.eup %1281 }
 0x3c3   :  { %v493_v41 = vsub.f32 1.0, %v1282_v52  ;;  %v497_v53 = vmul.f32 %v1282_v52, %v495_v0 }
 0x40f   :  { %v465_v60 = vpop.permute.xlu1 %464 }
 0x410   :  { %v486_v43 = vadd.f32 %v465_v60, %v1691_v62 }
 0x412   :  { %v488_v40 = vrot.slane %v486_v43, 4 }
 0x414   :  { %v490_v58 = vmul.f32 %v1280_v46, %v488_v40 }
 0x416   :  { %v491_v37 = vadd.f32 %v490_v58, %v1698_v47 }
 0x418   :  { %1283 = vtanh.f32 %v491_v37 }
 0x425   :  { %v1284_v36 = vpop.eup %1283 }
 0x426   :  { %v494_v42 = vmul.f32 %v1284_v36, %v493_v41 }
 0x428   :  { %v1788_v48 = vadd.f32 %v497_v53, %v494_v42 }
 0x42a   :  { %499 = vst [vmem:[#allocation2] sm:$0x30] %v1788_v48  ;;  %v501_v49 = vrot.slane %v1788_v48, 4 }
 0x42c   :  { %568 = vmatmul.mubr.f32.vlgmr.msra.gmra.mxu1 %v501_v49 }
 0x42d   :  { %710 = vmatpush1.msra.mxu1 %v1458_v3  ;;  %773 = vmatprep.mubr.f32.mxu1 %v2002_v59 }
 0x42e   :  { %711 = vmatprep.subr.mxu1 %v1460_v4 }
 0x42f   :  { %712 = vmatpush1.msra.mxu1 %v1463_v5 }
 0x430   :  { %713 = vmatprep.subr.mxu1 %v1467_v6 }
 0x431   :  { %714 = vmatpush1.msra.mxu1 %v1471_v7 }
 0x432   :  { %715 = vmatprep.subr.mxu1 %v1475_v8 }
 0x433   :  { %716 = vmatpush1.msra.mxu1 %v1479_v9 }
 0x434   :  { %717 = vmatprep.subr.mxu1 %v1483_v10 }
 0x435   :  { %718 = vmatpush1.msra.mxu1 %v1487_v11 }
 0x436   :  { %719 = vmatprep.subr.mxu1 %v1491_v12 }
 0x437   :  { %720 = vmatpush1.msra.mxu1 %v1495_v13 }
 0x438   :  { %721 = vmatprep.subr.mxu1 %v1499_v14 }
 0x439   :  { %722 = vmatpush1.msra.mxu1 %v1503_v15 }
 0x43a   :  { %723 = vmatprep.subr.mxu1 %v1510_v17 }
 0x43b   :  { %724 = vmatpush1.msra.mxu1 %v1513_v18 }
 0x43c   :  { %725 = vmatprep.subr.mxu1 %v1516_v19 }
 0x43d   :  { %726 = vmatpush1.msra.mxu1 %v1520_v20 }
 0x43e   :  { %727 = vmatprep.subr.mxu1 %v1524_v21 }
 0x43f   :  { %728 = vmatpush1.msra.mxu1 %v1527_v23 }
 0x440   :  { %729 = vmatprep.subr.mxu1 %v1530_v24 }
 0x441   :  { %730 = vmatpush1.msra.mxu1 %v1534_v25 }
 0x442   :  { %731 = vmatprep.subr.mxu1 %v1538_v26 }
 0x443   :  { %732 = vmatpush1.msra.mxu1 %v1542_v27 }
 0x444   :  { %733 = vmatprep.subr.mxu1 %v1546_v28 }
 0x445   :  { %734 = vmatpush1.msra.mxu1 %v1550_v29 }
 0x446   :  { %735 = vmatprep.subr.mxu1 %v1554_v30 }
 0x447   :  { %736 = vmatpush1.msra.mxu1 %v1558_v31 }
 0x448   :  { %737 = vmatprep.subr.mxu1 %v1562_v32 }
 0x449   :  { %738 = vmatpush1.msra.mxu1 %v1566_v33 }
 0x44a   :  { %739 = vmatprep.subr.mxu1 %v1570_v34 }
 0x44b   :  { %740 = vmatpush1.msra.mxu1 %v1574_v35 }
 0x44c   :  { %930 = vmatprep.subr.mxu1 %v1456_v2 }
 0x4ec   :  { %v569_v60 = vpop.f32.mrf.mxu1 }
 0x4ed   :  { %574 = vrot.lane.b32.xlu0 %v569_v60, %s1411_s1  ;;  %v577_v22 = vrot.slane %v569_v60, 2 }
 0x4ee   :  { %v571_v46 = vpop.f32.mrf.mxu1 }
 0x4ef   :  { %v579_v43 = vadd.f32 %v577_v22, %v1653_v54  ;;  %v587_v58 = vrot.slane %v571_v46, 2 }
 0x4f1   :  { %124 = vperm.xlu0 %1253, %v1828_v38   ;;  %v1178_v40 = vmul.f32 -1.442695, %v579_v43  ;;  %v589_v2 = vadd.f32 %v587_v58, %v1669_v1  ;;  %v605_v1 = vrot.slane %v1788_v48, 6  ;;  %v111_v48 = vpop.permute.xlu1 %110 }
 0x4f3   :  { %1285 = vpow2.f32 %v1178_v40  ;;  %v1179_v37 = vmul.f32 -1.442695, %v589_v2 }
 0x4f5   :  { %1287 = vpow2.f32 %v1179_v37 }
 0x500   :  { %v1286_v52 = vpop.eup %1285 }
 0x501   :  { %v583_v41 = vadd.f32 1.0, %v1286_v52 }
 0x502   :  { %v1288_v0 = vpop.eup %1287 }
 0x503   :  { %1289 = vrcp.f32 %v583_v41  ;;  %v593_v42 = vadd.f32 1.0, %v1288_v0  ;;  %v118_v0 = vmul.f32 %v1636_v44, %v111_v48 }
 0x505   :  { %1291 = vrcp.f32 %v593_v42 }
 0x510   :  { %v1290_v60 = vpop.eup %1289 }
 0x512   :  { %v1292_v43 = vpop.eup %1291 }
 0x513   :  { %v603_v40 = vsub.f32 1.0, %v1292_v43  ;;  %v607_v2 = vmul.f32 %v1292_v43, %v605_v1 }
 0x55f   :  { %v575_v36 = vpop.permute.xlu0 %574 }
 0x560   :  { %v596_v53 = vadd.f32 %v575_v36, %v1691_v62 }
 0x562   :  { %v598_v49 = vrot.slane %v596_v53, 2 }
 0x564   :  { %v600_v54 = vmul.f32 %v1290_v60, %v598_v49  ;;  %v146_v60 = vmul.f32 %v1655_v55, %v111_v48 }
 0x566   :  { %v601_v22 = vadd.f32 %v600_v54, %v1698_v47 }
 0x568   :  { %1293 = vtanh.f32 %v601_v22 }
 0x56c   :  { %v1877_v41 = vpop.permute.xlu0 %124 }
 0x56d   :  { %v132_v36 = vmul.f32 %v1640_v45, %v1877_v41  ;;  %v152_v54 = vmul.f32 %v1659_v56, %v1877_v41  ;;  %v172_v55 = vmul.f32 %v1680_v57, %v1877_v41 }
 0x56f   :  { %v134_v42 = vadd.f32 %v132_v36, %v118_v0  ;;  %v154_v43 = vadd.f32 %v152_v54, %v146_v60 }
 0x571   :  { %v1883_v53 = vadd.f32 %v1648_v51, %v134_v42  ;;  %v1890_v44 = vadd.f32 %v1666_v63, %v154_v43 }
 0x575   :  { %v1294_v46 = vpop.eup %1293 }
 0x576   :  { %v604_v58 = vmul.f32 %v1294_v46, %v603_v40 }
 0x578   :  { %v1838_v37 = vadd.f32 %v607_v2, %v604_v58  ;;  %v166_v58 = vmul.f32 %v1676_v50, %v111_v48 }
 0x57a   :  { %609 = vst [vmem:[#allocation2] sm:$0xc0] %v1838_v37  ;;  %v611_v52 = vrot.slane %v1838_v37, 6  ;;  %v174_v2 = vadd.f32 %v172_v55, %v166_v58 }
 0x57c   :  { %678 = vmatmul.mubr.f32.vlgmr.msra.gmra.mxu0 %v611_v52  ;;  %v1898_v42 = vadd.f32 %v1694_v16, %v174_v2 }
 0x57d   :  { %821 = vmatpush1.msra.mxu0 %v1458_v3  ;;  %884 = vmatprep.mubr.f32.mxu0 %v2002_v59 }
 0x57e   :  { %822 = vmatprep.subr.mxu0 %v1460_v4 }
 0x57f   :  { %823 = vmatpush1.msra.mxu0 %v1463_v5 }
 0x580   :  { %824 = vmatprep.subr.mxu0 %v1467_v6 }
 0x581   :  { %825 = vmatpush1.msra.mxu0 %v1471_v7 }
 0x582   :  { %826 = vmatprep.subr.mxu0 %v1475_v8 }
 0x583   :  { %827 = vmatpush1.msra.mxu0 %v1479_v9 }
 0x584   :  { %828 = vmatprep.subr.mxu0 %v1483_v10 }
 0x585   :  { %829 = vmatpush1.msra.mxu0 %v1487_v11 }
 0x586   :  { %830 = vmatprep.subr.mxu0 %v1491_v12 }
 0x587   :  { %831 = vmatpush1.msra.mxu0 %v1495_v13 }
 0x588   :  { %832 = vmatprep.subr.mxu0 %v1499_v14 }
 0x589   :  { %833 = vmatpush1.msra.mxu0 %v1503_v15 }
 0x58a   :  { %834 = vmatprep.subr.mxu0 %v1510_v17 }
 0x58b   :  { %835 = vmatpush1.msra.mxu0 %v1513_v18 }
 0x58c   :  { %836 = vmatprep.subr.mxu0 %v1516_v19 }
 0x58d   :  { %837 = vmatpush1.msra.mxu0 %v1520_v20 }
 0x58e   :  { %838 = vmatprep.subr.mxu0 %v1524_v21 }
 0x58f   :  { %839 = vmatpush1.msra.mxu0 %v1527_v23 }
 0x590   :  { %840 = vmatprep.subr.mxu0 %v1530_v24 }
 0x591   :  { %841 = vmatpush1.msra.mxu0 %v1534_v25 }
 0x592   :  { %842 = vmatprep.subr.mxu0 %v1538_v26 }
 0x593   :  { %843 = vmatpush1.msra.mxu0 %v1542_v27 }
 0x594   :  { %844 = vmatprep.subr.mxu0 %v1546_v28 }
 0x595   :  { %845 = vmatpush1.msra.mxu0 %v1550_v29 }
 0x596   :  { %846 = vmatprep.subr.mxu0 %v1554_v30 }
 0x597   :  { %847 = vmatpush1.msra.mxu0 %v1558_v31 }
 0x598   :  { %848 = vmatprep.subr.mxu0 %v1562_v32 }
 0x599   :  { %849 = vmatpush1.msra.mxu0 %v1566_v33 }
 0x59a   :  { %850 = vmatprep.subr.mxu0 %v1570_v34 }
 0x59b   :  { %851 = vmatpush1.msra.mxu0 %v1574_v35 }
 0x63c   :  { %v679_v47 = vpop.f32.mrf.mxu0 }
 0x63d   :  { %684 = vrot.lane.b32.xlu1 %v679_v47, %s1411_s1  ;;  %v686_v49 = vadd.f32 %v679_v47, %v1883_v53 }
 0x63e   :  { %v681_v40 = vpop.f32.mrf.mxu0 }
 0x63f   :  { %v1180_v22 = vmul.f32 -1.442695, %v686_v49  ;;  %v693_v45 = vadd.f32 %v681_v40, %v1890_v44 }
 0x641   :  { %1295 = vpow2.f32 %v1180_v22  ;;  %v1181_v1 = vmul.f32 -1.442695, %v693_v45 }
 0x643   :  { %1297 = vpow2.f32 %v1181_v1 }
 0x64e   :  { %v1296_v46 = vpop.eup %1295 }
 0x64f   :  { %v690_v51 = vadd.f32 1.0, %v1296_v46 }
 0x650   :  { %v1298_v56 = vpop.eup %1297 }
 0x651   :  { %1299 = vrcp.f32 %v690_v51  ;;  %v697_v47 = vadd.f32 1.0, %v1298_v56 }
 0x653   :  { %1301 = vrcp.f32 %v697_v47 }
 0x65e   :  { %v1300_v63 = vpop.eup %1299 }
 0x660   :  { %v1302_v54 = vpop.eup %1301 }
 0x661   :  { %v704_v50 = vsub.f32 1.0, %v1302_v54  ;;  %v706_v57 = vmul.f32 %v1302_v54, %v611_v52 }
 0x6af   :  { %v685_v0 = vpop.permute.xlu1 %684 }
 0x6b0   :  { %v700_v36 = vadd.f32 %v685_v0, %v1691_v62 }
 0x6b2   :  { %v701_v49 = vmul.f32 %v1300_v63, %v700_v36 }
 0x6b4   :  { %v702_v60 = vadd.f32 %v701_v49, %v1898_v42 }
 0x6b6   :  { %1303 = vtanh.f32 %v702_v60 }
 0x6c3   :  { %v1304_v48 = vpop.eup %1303 }
 0x6c4   :  { %v705_v22 = vmul.f32 %v1304_v48, %v704_v50 }
 0x6c6   :  { %v1903_v43 = vadd.f32 %v706_v57, %v705_v22  ;;  %v100_v22 = vld [vmem:[#allocation6 + $0x78] sm:$0xff]  ;;  %v99_v57 = vld [vmem:[#allocation6 + $0x70] sm:$0xff] }
 0x6c7   :  { %1206 = vmatprep.subr.mxu0 %v100_v22 }
 0x6c8   :  { %708 = vst [vmem:[#allocation2 + $0x8] sm:$0x3] %v1903_v43  ;;  %774 = vmatmul.mubr.f32.vlgmr.msra.gmra.mxu1 %v1903_v43 }
 0x6c9   :  { %931 = vmatpush1.msra.mxu1 %v1458_v3  ;;  %994 = vmatprep.mubr.f32.mxu1 %v2002_v59 }
 0x6ca   :  { %932 = vmatprep.subr.mxu1 %v1460_v4 }
 0x6cb   :  { %933 = vmatpush1.msra.mxu1 %v1463_v5 }
 0x6cc   :  { %934 = vmatprep.subr.mxu1 %v1467_v6 }
 0x6cd   :  { %935 = vmatpush1.msra.mxu1 %v1471_v7 }
 0x6ce   :  { %936 = vmatprep.subr.mxu1 %v1475_v8 }
 0x6cf   :  { %937 = vmatpush1.msra.mxu1 %v1479_v9 }
 0x6d0   :  { %938 = vmatprep.subr.mxu1 %v1483_v10 }
 0x6d1   :  { %939 = vmatpush1.msra.mxu1 %v1487_v11 }
 0x6d2   :  { %940 = vmatprep.subr.mxu1 %v1491_v12 }
 0x6d3   :  { %941 = vmatpush1.msra.mxu1 %v1495_v13 }
 0x6d4   :  { %942 = vmatprep.subr.mxu1 %v1499_v14 }
 0x6d5   :  { %943 = vmatpush1.msra.mxu1 %v1503_v15 }
 0x6d6   :  { %944 = vmatprep.subr.mxu1 %v1510_v17 }
 0x6d7   :  { %945 = vmatpush1.msra.mxu1 %v1513_v18 }
 0x6d8   :  { %946 = vmatprep.subr.mxu1 %v1516_v19 }
 0x6d9   :  { %947 = vmatpush1.msra.mxu1 %v1520_v20 }
 0x6da   :  { %948 = vmatprep.subr.mxu1 %v1524_v21 }
 0x6db   :  { %949 = vmatpush1.msra.mxu1 %v1527_v23 }
 0x6dc   :  { %950 = vmatprep.subr.mxu1 %v1530_v24  ;;  %v812_v24 = vrot.slane %v1903_v43, 6  ;;  %v98_v43 = vld [vmem:[#allocation6 + $0x68] sm:$0xff] }
 0x6dd   :  { %951 = vmatpush1.msra.mxu1 %v1534_v25 }
 0x6de   :  { %952 = vmatprep.subr.mxu1 %v1538_v26 }
 0x6df   :  { %953 = vmatpush1.msra.mxu1 %v1542_v27 }
 0x6e0   :  { %954 = vmatprep.subr.mxu1 %v1546_v28 }
 0x6e1   :  { %955 = vmatpush1.msra.mxu1 %v1550_v29 }
 0x6e2   :  { %956 = vmatprep.subr.mxu1 %v1554_v30 }
 0x6e3   :  { %957 = vmatpush1.msra.mxu1 %v1558_v31  ;;  %v1038_v31 = vld [vmem:[#allocation2] sm:$0xff] }
 0x6e4   :  { %958 = vmatprep.subr.mxu1 %v1562_v32 }
 0x6e5   :  { %959 = vmatpush1.msra.mxu1 %v1566_v33 }
 0x6e6   :  { %960 = vmatprep.subr.mxu1 %v1570_v34 }
 0x6e7   :  { %961 = vmatpush1.msra.mxu1 %v1574_v35 }
 0x788   :  { %v775_v3 = vpop.f32.mrf.mxu1 }
 0x789   :  { %780 = vrot.lane.b32.xlu0 %v775_v3, %s1411_s1  ;;  %v783_v4 = vrot.slane %v775_v3, 6  ;;  %v97_v3 = vld [vmem:[#allocation6 + $0x60] sm:$0xff] }
 0x78a   :  { %v777_v7 = vpop.f32.mrf.mxu1 }
 0x78b   :  { %v785_v5 = vadd.f32 %v783_v4, %v1883_v53  ;;  %v793_v8 = vrot.slane %v777_v7, 6  ;;  %v96_v4 = vld [vmem:[#allocation6 + $0x58] sm:$0xff]  ;;  %v94_v7 = vld [vmem:[#allocation6 + $0x48] sm:$0xff] }
 0x78d   :  { %v1182_v6 = vmul.f32 -1.442695, %v785_v5  ;;  %v795_v9 = vadd.f32 %v793_v8, %v1890_v44  ;;  %v95_v5 = vld [vmem:[#allocation6 + $0x50] sm:$0xff]  ;;  %v93_v8 = vld [vmem:[#allocation6 + $0x40] sm:$0xff] }
 0x78f   :  { %1305 = vpow2.f32 %v1182_v6  ;;  %v1183_v10 = vmul.f32 -1.442695, %v795_v9  ;;  %v92_v9 = vld [vmem:[#allocation6 + $0x38] sm:$0xff] }
 0x791   :  { %1307 = vpow2.f32 %v1183_v10  ;;  %v91_v10 = vld [vmem:[#allocation6 + $0x30] sm:$0xff] }
 0x79c   :  { %v1306_v11 = vpop.eup %1305 }
 0x79d   :  { %v789_v12 = vadd.f32 1.0, %v1306_v11  ;;  %v90_v11 = vld [vmem:[#allocation6 + $0x28] sm:$0xff] }
 0x79e   :  { %v1308_v13 = vpop.eup %1307 }
 0x79f   :  { %1309 = vrcp.f32 %v789_v12  ;;  %v799_v15 = vadd.f32 1.0, %v1308_v13  ;;  %v89_v12 = vld [vmem:[#allocation6 + $0x20] sm:$0xff]  ;;  %v88_v13 = vld [vmem:[#allocation6 + $0x18] sm:$0xff] }
 0x7a1   :  { %1311 = vrcp.f32 %v799_v15  ;;  %v86_v15 = vld [vmem:[#allocation6 + $0x8] sm:$0xff] }
 0x7ac   :  { %v1310_v19 = vpop.eup %1309 }
 0x7ae   :  { %v1312_v23 = vpop.eup %1311 }
 0x7af   :  { %v809_v25 = vsub.f32 1.0, %v1312_v23  ;;  %v814_v28 = vmul.f32 %v1312_v23, %v812_v24 }
 0x7fb   :  { %v781_v14 = vpop.permute.xlu0 %780 }
 0x7fc   :  { %v802_v17 = vadd.f32 %v781_v14, %v1691_v62  ;;  %v87_v14 = vld [vmem:[#allocation6 + $0x10] sm:$0xff] }
 0x7fe   :  { %v804_v18 = vrot.slane %v802_v17, 6  ;;  %v85_v17 = vld [vmem:[#allocation6] sm:$0xff] }
 0x800   :  { %v806_v20 = vmul.f32 %v1310_v19, %v804_v18 }
 0x802   :  { %v807_v21 = vadd.f32 %v806_v20, %v1898_v42 }
 0x804   :  { %1313 = vtanh.f32 %v807_v21 }
 0x811   :  { %v1314_v26 = vpop.eup %1313 }
 0x812   :  { %v810_v27 = vmul.f32 %v1314_v26, %v809_v25 }
 0x814   :  { %v815_v29 = vadd.f32 %v814_v28, %v810_v27 }
 0x816   :  { %816 = vst [vmem:[#allocation2 + $0x8] sm:$0xc] %v815_v29  ;;  %v818_v30 = vrot.slane %v815_v29, 2  ;;  %v922_v63 = vrot.slane %v815_v29, 6 }
 0x818   :  { %885 = vmatmul.mubr.f32.vlgmr.msra.gmra.mxu0 %v818_v30 }
 0x819   :  { %1238 = vmatprep.mubr.f32.mxu0 %v1038_v31  ;;  %1207 = vmatpush3.msra.mxu0 %v100_v22 }
 0x81a   :  { %1208 = vmatprep.subr.mxu0 %v99_v57 }
 0x81b   :  { %1209 = vmatpush3.msra.mxu0 %v99_v57 }
 0x81c   :  { %1210 = vmatprep.subr.mxu0 %v98_v43 }
 0x81d   :  { %1211 = vmatpush3.msra.mxu0 %v98_v43 }
 0x81e   :  { %1212 = vmatprep.subr.mxu0 %v97_v3 }
 0x81f   :  { %1213 = vmatpush3.msra.mxu0 %v97_v3 }
 0x820   :  { %1214 = vmatprep.subr.mxu0 %v96_v4 }
 0x821   :  { %1215 = vmatpush3.msra.mxu0 %v96_v4 }
 0x822   :  { %1216 = vmatprep.subr.mxu0 %v95_v5 }
 0x823   :  { %1217 = vmatpush3.msra.mxu0 %v95_v5 }
 0x824   :  { %1218 = vmatprep.subr.mxu0 %v94_v7 }
 0x825   :  { %1219 = vmatpush3.msra.mxu0 %v94_v7 }
 0x826   :  { %1220 = vmatprep.subr.mxu0 %v93_v8 }
 0x827   :  { %1221 = vmatpush3.msra.mxu0 %v93_v8 }
 0x828   :  { %1222 = vmatprep.subr.mxu0 %v92_v9 }
 0x829   :  { %1223 = vmatpush3.msra.mxu0 %v92_v9 }
 0x82a   :  { %1224 = vmatprep.subr.mxu0 %v91_v10 }
 0x82b   :  { %1225 = vmatpush3.msra.mxu0 %v91_v10 }
 0x82c   :  { %1226 = vmatprep.subr.mxu0 %v90_v11 }
 0x82d   :  { %1227 = vmatpush3.msra.mxu0 %v90_v11 }
 0x82e   :  { %1228 = vmatprep.subr.mxu0 %v89_v12 }
 0x82f   :  { %1229 = vmatpush3.msra.mxu0 %v89_v12 }
 0x830   :  { %1230 = vmatprep.subr.mxu0 %v88_v13 }
 0x831   :  { %1231 = vmatpush3.msra.mxu0 %v88_v13 }
 0x832   :  { %1232 = vmatprep.subr.mxu0 %v87_v14 }
 0x833   :  { %1233 = vmatpush3.msra.mxu0 %v87_v14 }
 0x834   :  { %1234 = vmatprep.subr.mxu0 %v86_v15 }
 0x835   :  { %1235 = vmatpush3.msra.mxu0 %v86_v15 }
 0x836   :  { %1236 = vmatprep.subr.mxu0 %v85_v17 }
 0x837   :  { %1237 = vmatpush3.msra.mxu0 %v85_v17 }
 0x8d8   :  { %v886_v32 = vpop.f32.mrf.mxu0 }
 0x8d9   :  { %891 = vrot.lane.b32.xlu1 %v886_v32, %s1411_s1  ;;  %v894_v33 = vrot.slane %v886_v32, 4 }
 0x8da   :  { %v888_v16 = vpop.f32.mrf.mxu0 }
 0x8db   :  { %v896_v34 = vadd.f32 %v894_v33, %v1883_v53  ;;  %v904_v59 = vrot.slane %v888_v16, 4 }
 0x8dd   :  { %v1184_v35 = vmul.f32 -1.442695, %v896_v34  ;;  %v906_v37 = vadd.f32 %v904_v59, %v1890_v44 }
 0x8df   :  { %1315 = vpow2.f32 %v1184_v35  ;;  %v1185_v52 = vmul.f32 -1.442695, %v906_v37 }
 0x8e1   :  { %1317 = vpow2.f32 %v1185_v52 }
 0x8ec   :  { %v1316_v40 = vpop.eup %1315 }
 0x8ed   :  { %v900_v45 = vadd.f32 1.0, %v1316_v40 }
 0x8ee   :  { %v1318_v1 = vpop.eup %1317 }
 0x8ef   :  { %1319 = vrcp.f32 %v900_v45  ;;  %v910_v51 = vadd.f32 1.0, %v1318_v1 }
 0x8f1   :  { %1321 = vrcp.f32 %v910_v51 }
 0x8fc   :  { %v1320_v56 = vpop.eup %1319 }
 0x8fe   :  { %v1322_v0 = vpop.eup %1321 }
 0x8ff   :  { %v920_v36 = vsub.f32 1.0, %v1322_v0  ;;  %v924_v54 = vmul.f32 %v1322_v0, %v922_v63  ;;  %v2006_v63 = vsub.s32 4, %v1629_v39 }
 0x94b   :  { %v892_v46 = vpop.permute.xlu1 %891 }
 0x94c   :  { %v913_v58 = vadd.f32 %v892_v46, %v1691_v62 }
 0x94e   :  { %v915_v55 = vrot.slane %v913_v58, 4 }
 0x950   :  { %v917_v2 = vmul.f32 %v1320_v56, %v915_v55  ;;  %v2005_v56 = vld [vmem:[#allocation12_spill] sm:$0xff] }
 0x952   :  { %v918_v47 = vadd.f32 %v917_v2, %v1898_v42 }
 0x954   :  { %1323 = vtanh.f32 %v918_v47 }
 0x961   :  { %v1324_v49 = vpop.eup %1323 }
 0x962   :  { %v921_v60 = vmul.f32 %v1324_v49, %v920_v36  ;;  %v1132_v49 = vrot.slane %v1688_v61, %v2006_v63 }
 0x964   :  { %v1950_v50 = vadd.f32 %v924_v54, %v921_v60 }
 0x966   :  { %926 = vst [vmem:[#allocation2 + $0x8] sm:$0x30] %v1950_v50  ;;  %v928_v48 = vrot.slane %v1950_v50, 4 }
 0x968   :  { %995 = vmatmul.mubr.f32.vlgmr.msra.gmra.mxu1 %v928_v48 }
 0xa28   :  { %v996_v6 = vpop.f32.mrf.mxu1 }
 0xa29   :  { %1001 = vrot.lane.b32.xlu0 %v996_v6, %s1411_s1  ;;  %v1004_v18 = vrot.slane %v996_v6, 2 }
 0xa2a   :  { %v998_v21 = vpop.f32.mrf.mxu1 }
 0xa2b   :  { %v1006_v19 = vadd.f32 %v1004_v18, %v1883_v53  ;;  %v1014_v23 = vrot.slane %v998_v21, 2 }
 0xa2d   :  { %v1186_v20 = vmul.f32 -1.442695, %v1006_v19  ;;  %v1016_v24 = vadd.f32 %v1014_v23, %v1890_v44  ;;  %v1032_v44 = vrot.slane %v1950_v50, 6 }
 0xa2f   :  { %1325 = vpow2.f32 %v1186_v20  ;;  %v1187_v25 = vmul.f32 -1.442695, %v1016_v24 }
 0xa31   :  { %1327 = vpow2.f32 %v1187_v25 }
 0xa3c   :  { %v1326_v26 = vpop.eup %1325 }
 0xa3d   :  { %v1010_v27 = vadd.f32 1.0, %v1326_v26 }
 0xa3e   :  { %v1328_v28 = vpop.eup %1327 }
 0xa3f   :  { %1329 = vrcp.f32 %v1010_v27  ;;  %v1020_v30 = vadd.f32 1.0, %v1328_v28 }
 0xa41   :  { %1331 = vrcp.f32 %v1020_v30 }
 0xa4c   :  { %v1330_v33 = vpop.eup %1329 }
 0xa4e   :  { %v1332_v35 = vpop.eup %1331 }
 0xa4f   :  { %v1030_v16 = vsub.f32 1.0, %v1332_v35  ;;  %v1034_v37 = vmul.f32 %v1332_v35, %v1032_v44 }
 0xa9b   :  { %v1002_v29 = vpop.permute.xlu0 %1001 }
 0xa9c   :  { %v1023_v31 = vadd.f32 %v1002_v29, %v1691_v62  ;;  %v2003_v62 = vsub.s32 3, %v1629_v39 }
 0xa9e   :  { %v1025_v32 = vrot.slane %v1023_v31, 2  ;;  %v1043_v1 = vrot.slane %v1688_v61, %v2003_v62 }
 0xaa0   :  { %v1027_v53 = vmul.f32 %v1330_v33, %v1025_v32  ;;  %v1045_v46 = vmul.f32 %v1043_v1, %v1877_v41  ;;  %v1044_v2 = vmul.f32 %v1043_v1, %v2005_v56 }
 0xaa2   :  { %v1028_v34 = vadd.f32 %v1027_v53, %v1898_v42  ;;  %v2004_v42 = vsub.s32 2, %v1629_v39 }
 0xaa4   :  { %1333 = vtanh.f32 %v1028_v34  ;;  %v1124_v51 = vrot.slane %v1688_v61, %v2004_v42 }
 0xab1   :  { %v1334_v59 = vpop.eup %1333 }
 0xab2   :  { %v1031_v52 = vmul.f32 %v1334_v59, %v1030_v16 }
 0xab4   :  { %v1035_v40 = vadd.f32 %v1034_v37, %v1031_v52 }
 0xab6   :  { %1036 = vst [vmem:[#allocation2 + $0x8] sm:$0xc0] %v1035_v40  ;;  %1037 = vst [vmem:[#allocation8 - $0x6] sm:$0xc0] %v1035_v40 }
 0xabd   :  { %v1039_v45 = vld [vmem:[#allocation2 + $0x8] sm:$0xff] }
 0xabe   :  { %1239 = vmatmul.mubr.f32.vlgmr.msra.gmra.mxu0 %v1039_v45 }
 0xb7e   :  { %v1240_v58 = vpop.f32.mrf.mxu0 }
 0xb7f   :  { %v1118_v55 = vadd.f32 %v1240_v58, %v1045_v46 }
 0xb80   :  { %v1112_v47 = vpop.f32.mrf.mxu0 }
 0xb81   :  { %v1126_v0 = vadd.f32 %v1124_v51, %v1118_v55  ;;  %v1113_v36 = vadd.f32 %v1112_v47, %v1044_v2 }
 0xb83   :  { %v1128_v60 = vmax.f32 %v1126_v0, 0.0  ;;  %v1125_v54 = vadd.f32 %v1124_v51, %v1113_v36 }
 0xb85   :  { %v1127_v50 = vmax.f32 %v1125_v54, 0.0  ;;  %v1134_v48 = vmul.f32 %v1132_v49, %v1128_v60 }
 0xb87   :  { %1137 = vadd.xlane.f32.xlu0 %v1134_v48  ;;  %v1133_v41 = vmul.f32 %v1132_v49, %v1127_v50 }
 0xb89   :  { %1135 = vadd.xlane.f32.xlu1 %v1133_v41 }
 0xb8a   :  { %1387 = shalt.err (!%p1384_p0)
}
 0xb8b   :  { %1163 = dma.vmem_to_hbm [thread:$0]  %s1161_s19, 32, %s1993_s6, [#allocation5]   ;;  %v2007_v22 = vsub.s32 5, %v1629_v39  ;;  %vm1149_vm0 = vcmask 7168   ;;  %v1335_v9 = vld [vmem:[%s1987_s0] sm:$0xff] }
 0xb8d   :  { %v1142_v57 = vrot.slane %v1688_v61, %v2007_v22 }
 0xc10   :  { %v1138_v43 = vpop.xlane.xlu0 %1137 }
 0xc11   :  { %v1144_v3 = vadd.f32 %v1142_v57, %v1138_v43 }
 0xc12   :  { %v1136_v4 = vpop.xlane.xlu1 %1135 }
 0xc13   :  { %v1146_v5 = vmul.f32 0.1, %v1144_v3  ;;  %v1143_v6 = vadd.f32 %v1142_v57, %v1136_v4 }
 0xc15   :  { %v1148_v7 = vadd.f32 %v1146_v5, %v1828_v38  ;;  %v1145_v8 = vmul.f32 0.1, %v1143_v6 }
 0xc17   :  { %1151 = vst.msk [vmem:[%s1992_s5 + $0x8] sm:$0xff] %vm1149_vm0, %v1148_v7  ;;  %v1147_v39 = vadd.f32 %v1335_v9, %v1145_v8 }
 0xc19   :  { %1150 = vst.msk [vmem:[%s1992_s5] sm:$0xff] %vm1149_vm0, %v1147_v39 }
 0xc1a   :  { %1400 = dma.done.wait [#allocation5], 32  }
 0xc1b   :  { %1401 = vsyncadd [#allocation5], 4294967264 }
 0xc1c   :  { %1169 = vsyncpa [#allocation4], 1 }
 0xc1d   :  { %1170 = vsyncpa [#allocation7], 1 }
 0xc1e   :  { %1171 = vsyncpa [#allocation5], 1 }

</bundles_post_ra>
